<compile_context>
chip_gen: v5e
topology: v5e:2x2
jax: 0.10.0
libtpu: 0.0.40
codegen_flags: <defaults>
</compile_context>

<pallas_src>
import jax
import jax.numpy as jnp
import numpy as np
from jax import lax
from jax.experimental import pallas as pl
from jax.experimental.pallas import tpu as pltpu


def gru_proj_kernel(x_ref, len_ref, wih_ref, whh_ref, bx_ref, bh_ref,
                    wproj_ref, bproj_ref, out_ref, gx_ref):
    """Full GRU recurrence + output projection, single kernel invocation.

    x_ref:     (S*B, E)   bf16  embedded tokens, time-major rows (t major, b minor)
    len_ref:   (B, 1)     i32   sequence lengths
    wih_ref:   (E, 3*Hp)  bf16  fused [r|z|n] input weights (H lane-padded)
    whh_ref:   (Hp, 3*Hp) bf16  fused [r|z|n] hidden weights (lane-padded)
    bx_ref:    (1, 3*Hp)  f32   [bih_r+bhh_r | bih_z+bhh_z | bih_n]
    bh_ref:    (1, 3*Hp)  f32   [0 | 0 | bhh_n]  (n-gate hidden bias stays inside r*(...))
    wproj_ref: (Hp, EMB)  bf16  projection weight (zero rows for padded H)
    bproj_ref: (1, EMB)   f32
    out_ref:   (B, EMB)   f32
    gx_ref:    (S, B, 3*Hp) f32 VMEM scratch for the hoisted input-gate activations
    """
    S, B, G = gx_ref.shape
    Hp = whh_ref.shape[0]

    # ---- hoisted input-gate matmul: one big MXU pass with M = S*B rows ----
    gx = jnp.dot(x_ref[...], wih_ref[...], preferred_element_type=jnp.float32)
    gx_ref[...] = (gx + bx_ref[...]).reshape(S, B, G)

    # Hoisted out of the time loop (JAX does not CSE broadcast_in_dim in loops).
    bh = jnp.broadcast_to(bh_ref[...], (B, G))
    len_col = len_ref[...]                                   # (B, 1) int32

    def step(t, h):
        gx_t = gx_ref[t]                                     # (B, 3Hp) f32
        gh = jnp.dot(h.astype(whh_ref.dtype), whh_ref[...],
                     preferred_element_type=jnp.float32) + bh        # (B, 3Hp)
        # fused r|z sigmoid over the contiguous first 2*Hp lane-aligned columns
        rz = jax.nn.sigmoid(gx_t[:, :2 * Hp] + gh[:, :2 * Hp])
        r = rz[:, :Hp]
        z = rz[:, Hp:]
        n = jnp.tanh(gx_t[:, 2 * Hp:] + r * gh[:, 2 * Hp:])
        h_new = (1.0 - z) * n + z * h
        # packed-sequence semantics: freeze h once t >= length[b]
        return jnp.where(t < len_col, h_new, h)

    h0 = jnp.zeros((B, Hp), jnp.float32)
    unroll = S if S <= 8 else 4          # avoid vreg spills from full unroll at large S
    h_last = lax.fori_loop(0, S, step, h0, unroll=unroll)

    out_ref[...] = (
        jnp.dot(h_last.astype(wproj_ref.dtype), wproj_ref[...],
                preferred_element_type=jnp.float32)
        + bproj_ref[...]
    ).astype(out_ref.dtype)


def _pad_axis(a, axis, new_size):
    pad = new_size - a.shape[axis]
    if pad <= 0:
        return a
    cfg = [(0, 0)] * a.ndim
    cfg[axis] = (0, pad)
    return jnp.pad(a, cfg)


def abc_meas_emb_forward(token_ids, lengths, params):
    """Equivalent of ABC_meas_emb_Model.forward on a packed (padded+lengths) batch.

    token_ids: (B, S) int32, lengths: (B,) int32
    params: emb_table (V,E), wih (3,E,H), whh (3,H,H),
            bih (3,1,H), bhh (3,1,H), wproj (H,EMB), bproj (1,EMB)
            (gate order [r, z, n], PyTorch convention)
    """
    B, S = token_ids.shape
    E = params["emb_table"].shape[1]
    H = params["wih"].shape[2]
    EMB = params["wproj"].shape[1]

    LANE = 128
    Hp = ((H + LANE - 1) // LANE) * LANE
    f32 = jnp.float32
    bf16 = jnp.bfloat16

    # ---- fused, H-lane-padded weights (bf16 MXU operands) & pre-summed f32 biases ----
    wih_p = _pad_axis(params["wih"], 2, Hp)                              # (3, E, Hp)
    wih_all = jnp.concatenate([wih_p[0], wih_p[1], wih_p[2]], axis=1).astype(bf16)   # (E, 3Hp)
    whh_p = _pad_axis(_pad_axis(params["whh"], 2, Hp), 1, Hp)            # (3, Hp, Hp)
    whh_all = jnp.concatenate([whh_p[0], whh_p[1], whh_p[2]], axis=1).astype(bf16)   # (Hp, 3Hp)

    b_r = _pad_axis(params["bih"][0] + params["bhh"][0], 1, Hp)          # r/z biases pre-summed
    b_z = _pad_axis(params["bih"][1] + params["bhh"][1], 1, Hp)
    b_nx = _pad_axis(params["bih"][2], 1, Hp)
    b_nh = _pad_axis(params["bhh"][2], 1, Hp)                            # stays inside r*(...)
    zeros_h = jnp.zeros((1, Hp), f32)
    bx_all = jnp.concatenate([b_r, b_z, b_nx], axis=1).astype(f32)       # (1, 3Hp)
    bh_all = jnp.concatenate([zeros_h, zeros_h, b_nh], axis=1).astype(f32)  # (1, 3Hp)

    wproj_p = _pad_axis(params["wproj"], 0, Hp).astype(bf16)             # (Hp, EMB)
    bproj = params["bproj"].astype(f32)                                  # (1, EMB)

    # ---- glue: bf16 embedding gather, directly time-major (no extra transpose) ----
    # TODO(synk): for large vocab, gather in-kernel via scalar-prefetched token ids
    #             + pl.Element row index_map (or manual DMA gather) instead of XLA.
    emb_bf16 = params["emb_table"].astype(bf16)                          # (V, E)
    x_emb = jnp.take(emb_bf16, token_ids.T, axis=0)                      # (S, B, E) bf16
    x_2d = x_emb.reshape(S * B, E)                                       # time-major rows

    len_col = lengths.astype(jnp.int32).reshape(B, 1)                    # (B, 1)

    grid_spec = pltpu.PrefetchScalarGridSpec(
        num_scalar_prefetch=0,
        grid=(1,),  # single launch; recurrence is an in-kernel loop
        in_specs=[
            pl.BlockSpec((S * B, E), lambda i: (0, 0)),      # x (bf16, E unpadded)
            pl.BlockSpec((B, 1), lambda i: (0, 0)),          # lengths
            pl.BlockSpec((E, 3 * Hp), lambda i: (0, 0)),     # fused W_ih (bf16)
            pl.BlockSpec((Hp, 3 * Hp), lambda i: (0, 0)),    # fused W_hh (bf16)
            pl.BlockSpec((1, 3 * Hp), lambda i: (0, 0)),     # bx (f32)
            pl.BlockSpec((1, 3 * Hp), lambda i: (0, 0)),     # bh (f32)
            pl.BlockSpec((Hp, EMB), lambda i: (0, 0)),       # W_proj (bf16)
            pl.BlockSpec((1, EMB), lambda i: (0, 0)),        # b_proj (f32)
        ],
        out_specs=pl.BlockSpec((B, EMB), lambda i: (0, 0)),
        scratch_shapes=[pltpu.VMEM((S, B, 3 * Hp), jnp.float32)],  # hoisted gx
    )

    return pl.pallas_call(
        gru_proj_kernel,
        out_shape=jax.ShapeDtypeStruct((B, EMB), f32),
        grid_spec=grid_spec,
        compiler_params=pltpu.CompilerParams(
            dimension_semantics=("arbitrary",)),  # recurrent -> sequential
    )(x_2d, len_col, wih_all, whh_all, bx_all, bh_all, wproj_p, bproj)


def reference_forward(token_ids, lengths, params):
    """Pure-JAX f32 reference (lax.scan GRU, unpadded) for correctness checking."""
    x = jnp.take(params["emb_table"], token_ids, axis=0).astype(jnp.float32)  # (B,S,E)
    x = jnp.transpose(x, (1, 0, 2))                                           # (S,B,E)
    B = token_ids.shape[0]
    H = params["wih"].shape[2]

    def step(h, inp):
        x_t, t = inp
        i_r = x_t @ params["wih"][0] + params["bih"][0]
        i_z = x_t @ params["wih"][1] + params["bih"][1]
        i_n = x_t @ params["wih"][2] + params["bih"][2]
        h_r = h @ params["whh"][0] + params["bhh"][0]
        h_z = h @ params["whh"][1] + params["bhh"][1]
        h_n = h @ params["whh"][2] + params["bhh"][2]
        r = jax.nn.sigmoid(i_r + h_r)
        z = jax.nn.sigmoid(i_z + h_z)
        n = jnp.tanh(i_n + r * h_n)
        h_new = (1.0 - z) * n + z * h
        m = (t < lengths).astype(jnp.float32)[:, None]
        return m * h_new + (1.0 - m) * h, None

    h0 = jnp.zeros((B, H), jnp.float32)
    h_last, _ = jax.lax.scan(step, h0, (x, jnp.arange(x.shape[0], dtype=jnp.int32)))
    return h_last @ params["wproj"] + params["bproj"]


if __name__ == "__main__":
    # small shapes: batch=8, seq=8, vocab=32, emb_in=32, hidden=32, emb_size=128
    B, S, V, E, H, EMB = 8, 8, 32, 32, 32, 128

    key = jax.random.PRNGKey(0)
    k_tok, k_len, k_emb, k_wih, k_whh, k_bih, k_bhh, k_wp, k_bp = jax.random.split(key, 9)

    token_ids = jax.random.randint(k_tok, (B, S), 0, V, dtype=jnp.int32)
    lengths = jax.random.randint(k_len, (B,), 1, S + 1, dtype=jnp.int32)

    s = 1.0 / np.sqrt(H)
    params = {
        "emb_table": jax.random.normal(k_emb, (V, E), jnp.float32) * 0.1,
        "wih": jax.random.uniform(k_wih, (3, E, H), jnp.float32, -s, s),
        "whh": jax.random.uniform(k_whh, (3, H, H), jnp.float32, -s, s),
        "bih": jax.random.uniform(k_bih, (3, 1, H), jnp.float32, -s, s),
        "bhh": jax.random.uniform(k_bhh, (3, 1, H), jnp.float32, -s, s),
        "wproj": jax.random.uniform(k_wp, (H, EMB), jnp.float32, -s, s),
        "bproj": jax.random.uniform(k_bp, (1, EMB), jnp.float32, -s, s),
    }

    out = jax.jit(abc_meas_emb_forward)(token_ids, lengths, params)
    out = jax.block_until_ready(out)

    ref = jax.block_until_ready(reference_forward(token_ids, lengths, params))
    # bf16 MXU operands with f32 accumulation -> slightly looser tolerance than pure f32.
    np.testing.assert_allclose(np.asarray(out), np.asarray(ref), rtol=2e-2, atol=2e-2)

    assert out.shape == (B, EMB)
    print("KERNEL_OK")
</pallas_src>

<mosaic_0001>
module attributes {stable_mosaic.version = 11 : i64} {
  func.func @gru_proj_kernel(%arg0: i32, %arg1: memref<64x32xbf16, #tpu.memory_space<vmem>>, %arg2: memref<8x1xi32, #tpu.memory_space<vmem>>, %arg3: memref<32x384xbf16, #tpu.memory_space<vmem>>, %arg4: memref<128x384xbf16, #tpu.memory_space<vmem>>, %arg5: memref<1x384xf32, #tpu.memory_space<vmem>>, %arg6: memref<1x384xf32, #tpu.memory_space<vmem>>, %arg7: memref<128x128xbf16, #tpu.memory_space<vmem>>, %arg8: memref<1x128xf32, #tpu.memory_space<vmem>>, %arg9: memref<8x128xf32, #tpu.memory_space<vmem>>, %arg10: memref<8x8x384xf32, #tpu.memory_space<vmem>>) attributes {dimension_semantics = [#tpu.dimension_semantics<arbitrary>], iteration_bounds = array<i64: 1>, scalar_prefetch = 0 : i64, scratch_operands = 1 : i64, tpu.core_type = #tpu.core_type<tc>, window_params = [{pipeline_mode = #tpu.pipeline_mode<synchronous>, transform_indices = @transform_0, window_bounds = array<i64: 64, 32>}, {pipeline_mode = #tpu.pipeline_mode<synchronous>, transform_indices = @transform_1, window_bounds = array<i64: 8, 1>}, {pipeline_mode = #tpu.pipeline_mode<synchronous>, transform_indices = @transform_2, window_bounds = array<i64: 32, 384>}, {pipeline_mode = #tpu.pipeline_mode<synchronous>, transform_indices = @transform_3, window_bounds = array<i64: 128, 384>}, {pipeline_mode = #tpu.pipeline_mode<synchronous>, transform_indices = @transform_4, window_bounds = array<i64: 1, 384>}, {pipeline_mode = #tpu.pipeline_mode<synchronous>, transform_indices = @transform_5, window_bounds = array<i64: 1, 384>}, {pipeline_mode = #tpu.pipeline_mode<synchronous>, transform_indices = @transform_6, window_bounds = array<i64: 128, 128>}, {pipeline_mode = #tpu.pipeline_mode<synchronous>, transform_indices = @transform_7, window_bounds = array<i64: 1, 128>}, {pipeline_mode = #tpu.pipeline_mode<synchronous>, transform_indices = @transform_8, window_bounds = array<i64: 8, 128>}]} {
    %c0 = arith.constant 0 : index
    %c0_0 = arith.constant 0 : index
    %0 = vector.load %arg1[%c0, %c0_0] : memref<64x32xbf16, #tpu.memory_space<vmem>>, vector<64x32xbf16>
    %c0_1 = arith.constant 0 : index
    %c0_2 = arith.constant 0 : index
    %1 = vector.load %arg3[%c0_1, %c0_2] : memref<32x384xbf16, #tpu.memory_space<vmem>>, vector<32x384xbf16>
    %cst = arith.constant dense<0.000000e+00> : vector<64x384xf32>
    %2 = tpu.matmul %0, %1, %cst {dimension_numbers = #tpu.dot_dimension_numbers<[1], [0], [0], [1], [0, 0, 1, 1], [], []>} : vector<64x32xbf16>, vector<32x384xbf16>, vector<64x384xf32> -> vector<64x384xf32>
    %c0_3 = arith.constant 0 : index
    %c0_4 = arith.constant 0 : index
    %3 = vector.load %arg5[%c0_3, %c0_4] : memref<1x384xf32, #tpu.memory_space<vmem>>, vector<1x384xf32>
    %4 = vector.broadcast %3 : vector<1x384xf32> to vector<64x384xf32>
    %5 = arith.addf %2, %4 : vector<64x384xf32>
    %6 = vector.shape_cast %5 : vector<64x384xf32> to vector<8x8x384xf32>
    %c0_5 = arith.constant 0 : index
    %c0_6 = arith.constant 0 : index
    %c0_7 = arith.constant 0 : index
    %7 = vector.load %arg10[%c0_5, %c0_6, %c0_7] : memref<8x8x384xf32, #tpu.memory_space<vmem>>, vector<8x8x384xf32>
    tpu.vector_store %arg10[%c0_5, %c0_6, %c0_7], %6 {strides = array<i32>} : memref<8x8x384xf32, #tpu.memory_space<vmem>>, vector<8x8x384xf32>,
    %c0_8 = arith.constant 0 : index
    %c0_9 = arith.constant 0 : index
    %8 = vector.load %arg6[%c0_8, %c0_9] : memref<1x384xf32, #tpu.memory_space<vmem>>, vector<1x384xf32>
    %9 = vector.shape_cast %8 : vector<1x384xf32> to vector<1x384xf32>
    %10 = vector.broadcast %9 : vector<1x384xf32> to vector<8x384xf32>
    %c0_10 = arith.constant 0 : index
    %c0_11 = arith.constant 0 : index
    %11 = vector.load %arg2[%c0_10, %c0_11] : memref<8x1xi32, #tpu.memory_space<vmem>>, vector<8x1xi32>
    %cst_12 = arith.constant 0.000000e+00 : f32
    %12 = vector.broadcast %cst_12 : f32 to vector<8x128xf32>
    %c0_i32 = arith.constant 0 : i32
    %13 = arith.index_cast %c0_i32 : i32 to index
    %c0_13 = arith.constant 0 : index
    %c0_14 = arith.constant 0 : index
    %14 = vector.load %arg10[%13, %c0_13, %c0_14] : memref<8x8x384xf32, #tpu.memory_space<vmem>>, vector<1x8x384xf32>
    %15 = vector.shape_cast %14 : vector<1x8x384xf32> to vector<8x384xf32>
    %16 = arith.truncf %12 : vector<8x128xf32> to vector<8x128xbf16>
    %c0_15 = arith.constant 0 : index
    %c0_16 = arith.constant 0 : index
    %17 = vector.load %arg4[%c0_15, %c0_16] : memref<128x384xbf16, #tpu.memory_space<vmem>>, vector<128x384xbf16>
    %cst_17 = arith.constant dense<0.000000e+00> : vector<8x384xf32>
    %18 = tpu.matmul %16, %17, %cst_17 {dimension_numbers = #tpu.dot_dimension_numbers<[1], [0], [0], [1], [0, 0, 1, 1], [], []>} : vector<8x128xbf16>, vector<128x384xbf16>, vector<8x384xf32> -> vector<8x384xf32>
    %19 = arith.addf %18, %10 : vector<8x384xf32>
    %20 = vector.extract_strided_slice %15 {offsets = [0, 0], sizes = [8, 256], strides = [1, 1]} : vector<8x384xf32> to vector<8x256xf32>
    %21 = vector.extract_strided_slice %19 {offsets = [0, 0], sizes = [8, 256], strides = [1, 1]} : vector<8x384xf32> to vector<8x256xf32>
    %22 = arith.addf %20, %21 : vector<8x256xf32>
    %23 = arith.negf %22 : vector<8x256xf32>
    %24 = math.exp %23 : vector<8x256xf32>
    %cst_18 = arith.constant 1.000000e+00 : f32
    %25 = vector.broadcast %cst_18 : f32 to vector<8x256xf32>
    %26 = arith.addf %25, %24 : vector<8x256xf32>
    %27 = arith.divf %25, %26 : vector<8x256xf32>
    %28 = vector.extract_strided_slice %27 {offsets = [0, 0], sizes = [8, 128], strides = [1, 1]} : vector<8x256xf32> to vector<8x128xf32>
    %29 = vector.extract_strided_slice %27 {offsets = [0, 128], sizes = [8, 128], strides = [1, 1]} : vector<8x256xf32> to vector<8x128xf32>
    %30 = vector.extract_strided_slice %15 {offsets = [0, 256], sizes = [8, 128], strides = [1, 1]} : vector<8x384xf32> to vector<8x128xf32>
    %31 = vector.extract_strided_slice %19 {offsets = [0, 256], sizes = [8, 128], strides = [1, 1]} : vector<8x384xf32> to vector<8x128xf32>
    %32 = arith.mulf %28, %31 : vector<8x128xf32>
    %33 = arith.addf %30, %32 : vector<8x128xf32>
    %34 = math.tanh %33 : vector<8x128xf32>
    %cst_19 = arith.constant 1.000000e+00 : f32
    %35 = vector.broadcast %cst_19 : f32 to vector<8x128xf32>
    %36 = arith.subf %35, %29 : vector<8x128xf32>
    %37 = arith.mulf %36, %34 : vector<8x128xf32>
    %38 = arith.mulf %29, %12 : vector<8x128xf32>
    %39 = arith.addf %37, %38 : vector<8x128xf32>
    %40 = vector.broadcast %c0_i32 : i32 to vector<8x1xi32>
    %41 = arith.cmpi slt, %40, %11 : vector<8x1xi32>
    %42 = vector.shape_cast %41 : vector<8x1xi1> to vector<8x1xi1>
    %43 = vector.broadcast %42 : vector<8x1xi1> to vector<8x128xi1>
    %44 = arith.select %43, %39, %12 : vector<8x128xi1>, vector<8x128xf32>
    %c1_i32 = arith.constant 1 : i32
    %45 = arith.index_cast %c1_i32 : i32 to index
    %c0_20 = arith.constant 0 : index
    %c0_21 = arith.constant 0 : index
    %46 = vector.load %arg10[%45, %c0_20, %c0_21] : memref<8x8x384xf32, #tpu.memory_space<vmem>>, vector<1x8x384xf32>
    %47 = vector.shape_cast %46 : vector<1x8x384xf32> to vector<8x384xf32>
    %48 = arith.truncf %44 : vector<8x128xf32> to vector<8x128xbf16>
    %c0_22 = arith.constant 0 : index
    %c0_23 = arith.constant 0 : index
    %49 = vector.load %arg4[%c0_22, %c0_23] : memref<128x384xbf16, #tpu.memory_space<vmem>>, vector<128x384xbf16>
    %cst_24 = arith.constant dense<0.000000e+00> : vector<8x384xf32>
    %50 = tpu.matmul %48, %49, %cst_24 {dimension_numbers = #tpu.dot_dimension_numbers<[1], [0], [0], [1], [0, 0, 1, 1], [], []>} : vector<8x128xbf16>, vector<128x384xbf16>, vector<8x384xf32> -> vector<8x384xf32>
    %51 = arith.addf %50, %10 : vector<8x384xf32>
    %52 = vector.extract_strided_slice %47 {offsets = [0, 0], sizes = [8, 256], strides = [1, 1]} : vector<8x384xf32> to vector<8x256xf32>
    %53 = vector.extract_strided_slice %51 {offsets = [0, 0], sizes = [8, 256], strides = [1, 1]} : vector<8x384xf32> to vector<8x256xf32>
    %54 = arith.addf %52, %53 : vector<8x256xf32>
    %55 = arith.negf %54 : vector<8x256xf32>
    %56 = math.exp %55 : vector<8x256xf32>
    %cst_25 = arith.constant 1.000000e+00 : f32
    %57 = vector.broadcast %cst_25 : f32 to vector<8x256xf32>
    %58 = arith.addf %57, %56 : vector<8x256xf32>
    %59 = arith.divf %57, %58 : vector<8x256xf32>
    %60 = vector.extract_strided_slice %59 {offsets = [0, 0], sizes = [8, 128], strides = [1, 1]} : vector<8x256xf32> to vector<8x128xf32>
    %61 = vector.extract_strided_slice %59 {offsets = [0, 128], sizes = [8, 128], strides = [1, 1]} : vector<8x256xf32> to vector<8x128xf32>
    %62 = vector.extract_strided_slice %47 {offsets = [0, 256], sizes = [8, 128], strides = [1, 1]} : vector<8x384xf32> to vector<8x128xf32>
    %63 = vector.extract_strided_slice %51 {offsets = [0, 256], sizes = [8, 128], strides = [1, 1]} : vector<8x384xf32> to vector<8x128xf32>
    %64 = arith.mulf %60, %63 : vector<8x128xf32>
    %65 = arith.addf %62, %64 : vector<8x128xf32>
    %66 = math.tanh %65 : vector<8x128xf32>
    %cst_26 = arith.constant 1.000000e+00 : f32
    %67 = vector.broadcast %cst_26 : f32 to vector<8x128xf32>
    %68 = arith.subf %67, %61 : vector<8x128xf32>
    %69 = arith.mulf %68, %66 : vector<8x128xf32>
    %70 = arith.mulf %61, %44 : vector<8x128xf32>
    %71 = arith.addf %69, %70 : vector<8x128xf32>
    %72 = vector.broadcast %c1_i32 : i32 to vector<8x1xi32>
    %73 = arith.cmpi slt, %72, %11 : vector<8x1xi32>
    %74 = vector.shape_cast %73 : vector<8x1xi1> to vector<8x1xi1>
    %75 = vector.broadcast %74 : vector<8x1xi1> to vector<8x128xi1>
    %76 = arith.select %75, %71, %44 : vector<8x128xi1>, vector<8x128xf32>
    %c2_i32 = arith.constant 2 : i32
    %77 = arith.index_cast %c2_i32 : i32 to index
    %c0_27 = arith.constant 0 : index
    %c0_28 = arith.constant 0 : index
    %78 = vector.load %arg10[%77, %c0_27, %c0_28] : memref<8x8x384xf32, #tpu.memory_space<vmem>>, vector<1x8x384xf32>
    %79 = vector.shape_cast %78 : vector<1x8x384xf32> to vector<8x384xf32>
    %80 = arith.truncf %76 : vector<8x128xf32> to vector<8x128xbf16>
    %c0_29 = arith.constant 0 : index
    %c0_30 = arith.constant 0 : index
    %81 = vector.load %arg4[%c0_29, %c0_30] : memref<128x384xbf16, #tpu.memory_space<vmem>>, vector<128x384xbf16>
    %cst_31 = arith.constant dense<0.000000e+00> : vector<8x384xf32>
    %82 = tpu.matmul %80, %81, %cst_31 {dimension_numbers = #tpu.dot_dimension_numbers<[1], [0], [0], [1], [0, 0, 1, 1], [], []>} : vector<8x128xbf16>, vector<128x384xbf16>, vector<8x384xf32> -> vector<8x384xf32>
    %83 = arith.addf %82, %10 : vector<8x384xf32>
    %84 = vector.extract_strided_slice %79 {offsets = [0, 0], sizes = [8, 256], strides = [1, 1]} : vector<8x384xf32> to vector<8x256xf32>
    %85 = vector.extract_strided_slice %83 {offsets = [0, 0], sizes = [8, 256], strides = [1, 1]} : vector<8x384xf32> to vector<8x256xf32>
    %86 = arith.addf %84, %85 : vector<8x256xf32>
    %87 = arith.negf %86 : vector<8x256xf32>
    %88 = math.exp %87 : vector<8x256xf32>
    %cst_32 = arith.constant 1.000000e+00 : f32
    %89 = vector.broadcast %cst_32 : f32 to vector<8x256xf32>
    %90 = arith.addf %89, %88 : vector<8x256xf32>
    %91 = arith.divf %89, %90 : vector<8x256xf32>
    %92 = vector.extract_strided_slice %91 {offsets = [0, 0], sizes = [8, 128], strides = [1, 1]} : vector<8x256xf32> to vector<8x128xf32>
    %93 = vector.extract_strided_slice %91 {offsets = [0, 128], sizes = [8, 128], strides = [1, 1]} : vector<8x256xf32> to vector<8x128xf32>
    %94 = vector.extract_strided_slice %79 {offsets = [0, 256], sizes = [8, 128], strides = [1, 1]} : vector<8x384xf32> to vector<8x128xf32>
    %95 = vector.extract_strided_slice %83 {offsets = [0, 256], sizes = [8, 128], strides = [1, 1]} : vector<8x384xf32> to vector<8x128xf32>
    %96 = arith.mulf %92, %95 : vector<8x128xf32>
    %97 = arith.addf %94, %96 : vector<8x128xf32>
    %98 = math.tanh %97 : vector<8x128xf32>
    %cst_33 = arith.constant 1.000000e+00 : f32
    %99 = vector.broadcast %cst_33 : f32 to vector<8x128xf32>
    %100 = arith.subf %99, %93 : vector<8x128xf32>
    %101 = arith.mulf %100, %98 : vector<8x128xf32>
    %102 = arith.mulf %93, %76 : vector<8x128xf32>
    %103 = arith.addf %101, %102 : vector<8x128xf32>
    %104 = vector.broadcast %c2_i32 : i32 to vector<8x1xi32>
    %105 = arith.cmpi slt, %104, %11 : vector<8x1xi32>
    %106 = vector.shape_cast %105 : vector<8x1xi1> to vector<8x1xi1>
    %107 = vector.broadcast %106 : vector<8x1xi1> to vector<8x128xi1>
    %108 = arith.select %107, %103, %76 : vector<8x128xi1>, vector<8x128xf32>
    %c3_i32 = arith.constant 3 : i32
    %109 = arith.index_cast %c3_i32 : i32 to index
    %c0_34 = arith.constant 0 : index
    %c0_35 = arith.constant 0 : index
    %110 = vector.load %arg10[%109, %c0_34, %c0_35] : memref<8x8x384xf32, #tpu.memory_space<vmem>>, vector<1x8x384xf32>
    %111 = vector.shape_cast %110 : vector<1x8x384xf32> to vector<8x384xf32>
    %112 = arith.truncf %108 : vector<8x128xf32> to vector<8x128xbf16>
    %c0_36 = arith.constant 0 : index
    %c0_37 = arith.constant 0 : index
    %113 = vector.load %arg4[%c0_36, %c0_37] : memref<128x384xbf16, #tpu.memory_space<vmem>>, vector<128x384xbf16>
    %cst_38 = arith.constant dense<0.000000e+00> : vector<8x384xf32>
    %114 = tpu.matmul %112, %113, %cst_38 {dimension_numbers = #tpu.dot_dimension_numbers<[1], [0], [0], [1], [0, 0, 1, 1], [], []>} : vector<8x128xbf16>, vector<128x384xbf16>, vector<8x384xf32> -> vector<8x384xf32>
    %115 = arith.addf %114, %10 : vector<8x384xf32>
    %116 = vector.extract_strided_slice %111 {offsets = [0, 0], sizes = [8, 256], strides = [1, 1]} : vector<8x384xf32> to vector<8x256xf32>
    %117 = vector.extract_strided_slice %115 {offsets = [0, 0], sizes = [8, 256], strides = [1, 1]} : vector<8x384xf32> to vector<8x256xf32>
    %118 = arith.addf %116, %117 : vector<8x256xf32>
    %119 = arith.negf %118 : vector<8x256xf32>
    %120 = math.exp %119 : vector<8x256xf32>
    %cst_39 = arith.constant 1.000000e+00 : f32
    %121 = vector.broadcast %cst_39 : f32 to vector<8x256xf32>
    %122 = arith.addf %121, %120 : vector<8x256xf32>
    %123 = arith.divf %121, %122 : vector<8x256xf32>
    %124 = vector.extract_strided_slice %123 {offsets = [0, 0], sizes = [8, 128], strides = [1, 1]} : vector<8x256xf32> to vector<8x128xf32>
    %125 = vector.extract_strided_slice %123 {offsets = [0, 128], sizes = [8, 128], strides = [1, 1]} : vector<8x256xf32> to vector<8x128xf32>
    %126 = vector.extract_strided_slice %111 {offsets = [0, 256], sizes = [8, 128], strides = [1, 1]} : vector<8x384xf32> to vector<8x128xf32>
    %127 = vector.extract_strided_slice %115 {offsets = [0, 256], sizes = [8, 128], strides = [1, 1]} : vector<8x384xf32> to vector<8x128xf32>
    %128 = arith.mulf %124, %127 : vector<8x128xf32>
    %129 = arith.addf %126, %128 : vector<8x128xf32>
    %130 = math.tanh %129 : vector<8x128xf32>
    %cst_40 = arith.constant 1.000000e+00 : f32
    %131 = vector.broadcast %cst_40 : f32 to vector<8x128xf32>
    %132 = arith.subf %131, %125 : vector<8x128xf32>
    %133 = arith.mulf %132, %130 : vector<8x128xf32>
    %134 = arith.mulf %125, %108 : vector<8x128xf32>
    %135 = arith.addf %133, %134 : vector<8x128xf32>
    %136 = vector.broadcast %c3_i32 : i32 to vector<8x1xi32>
    %137 = arith.cmpi slt, %136, %11 : vector<8x1xi32>
    %138 = vector.shape_cast %137 : vector<8x1xi1> to vector<8x1xi1>
    %139 = vector.broadcast %138 : vector<8x1xi1> to vector<8x128xi1>
    %140 = arith.select %139, %135, %108 : vector<8x128xi1>, vector<8x128xf32>
    %c4_i32 = arith.constant 4 : i32
    %141 = arith.index_cast %c4_i32 : i32 to index
    %c0_41 = arith.constant 0 : index
    %c0_42 = arith.constant 0 : index
    %142 = vector.load %arg10[%141, %c0_41, %c0_42] : memref<8x8x384xf32, #tpu.memory_space<vmem>>, vector<1x8x384xf32>
    %143 = vector.shape_cast %142 : vector<1x8x384xf32> to vector<8x384xf32>
    %144 = arith.truncf %140 : vector<8x128xf32> to vector<8x128xbf16>
    %c0_43 = arith.constant 0 : index
    %c0_44 = arith.constant 0 : index
    %145 = vector.load %arg4[%c0_43, %c0_44] : memref<128x384xbf16, #tpu.memory_space<vmem>>, vector<128x384xbf16>
    %cst_45 = arith.constant dense<0.000000e+00> : vector<8x384xf32>
    %146 = tpu.matmul %144, %145, %cst_45 {dimension_numbers = #tpu.dot_dimension_numbers<[1], [0], [0], [1], [0, 0, 1, 1], [], []>} : vector<8x128xbf16>, vector<128x384xbf16>, vector<8x384xf32> -> vector<8x384xf32>
    %147 = arith.addf %146, %10 : vector<8x384xf32>
    %148 = vector.extract_strided_slice %143 {offsets = [0, 0], sizes = [8, 256], strides = [1, 1]} : vector<8x384xf32> to vector<8x256xf32>
    %149 = vector.extract_strided_slice %147 {offsets = [0, 0], sizes = [8, 256], strides = [1, 1]} : vector<8x384xf32> to vector<8x256xf32>
    %150 = arith.addf %148, %149 : vector<8x256xf32>
    %151 = arith.negf %150 : vector<8x256xf32>
    %152 = math.exp %151 : vector<8x256xf32>
    %cst_46 = arith.constant 1.000000e+00 : f32
    %153 = vector.broadcast %cst_46 : f32 to vector<8x256xf32>
    %154 = arith.addf %153, %152 : vector<8x256xf32>
    %155 = arith.divf %153, %154 : vector<8x256xf32>
    %156 = vector.extract_strided_slice %155 {offsets = [0, 0], sizes = [8, 128], strides = [1, 1]} : vector<8x256xf32> to vector<8x128xf32>
    %157 = vector.extract_strided_slice %155 {offsets = [0, 128], sizes = [8, 128], strides = [1, 1]} : vector<8x256xf32> to vector<8x128xf32>
    %158 = vector.extract_strided_slice %143 {offsets = [0, 256], sizes = [8, 128], strides = [1, 1]} : vector<8x384xf32> to vector<8x128xf32>
    %159 = vector.extract_strided_slice %147 {offsets = [0, 256], sizes = [8, 128], strides = [1, 1]} : vector<8x384xf32> to vector<8x128xf32>
    %160 = arith.mulf %156, %159 : vector<8x128xf32>
    %161 = arith.addf %158, %160 : vector<8x128xf32>
    %162 = math.tanh %161 : vector<8x128xf32>
    %cst_47 = arith.constant 1.000000e+00 : f32
    %163 = vector.broadcast %cst_47 : f32 to vector<8x128xf32>
    %164 = arith.subf %163, %157 : vector<8x128xf32>
    %165 = arith.mulf %164, %162 : vector<8x128xf32>
    %166 = arith.mulf %157, %140 : vector<8x128xf32>
    %167 = arith.addf %165, %166 : vector<8x128xf32>
    %168 = vector.broadcast %c4_i32 : i32 to vector<8x1xi32>
    %169 = arith.cmpi slt, %168, %11 : vector<8x1xi32>
    %170 = vector.shape_cast %169 : vector<8x1xi1> to vector<8x1xi1>
    %171 = vector.broadcast %170 : vector<8x1xi1> to vector<8x128xi1>
    %172 = arith.select %171, %167, %140 : vector<8x128xi1>, vector<8x128xf32>
    %c5_i32 = arith.constant 5 : i32
    %173 = arith.index_cast %c5_i32 : i32 to index
    %c0_48 = arith.constant 0 : index
    %c0_49 = arith.constant 0 : index
    %174 = vector.load %arg10[%173, %c0_48, %c0_49] : memref<8x8x384xf32, #tpu.memory_space<vmem>>, vector<1x8x384xf32>
    %175 = vector.shape_cast %174 : vector<1x8x384xf32> to vector<8x384xf32>
    %176 = arith.truncf %172 : vector<8x128xf32> to vector<8x128xbf16>
    %c0_50 = arith.constant 0 : index
    %c0_51 = arith.constant 0 : index
    %177 = vector.load %arg4[%c0_50, %c0_51] : memref<128x384xbf16, #tpu.memory_space<vmem>>, vector<128x384xbf16>
    %cst_52 = arith.constant dense<0.000000e+00> : vector<8x384xf32>
    %178 = tpu.matmul %176, %177, %cst_52 {dimension_numbers = #tpu.dot_dimension_numbers<[1], [0], [0], [1], [0, 0, 1, 1], [], []>} : vector<8x128xbf16>, vector<128x384xbf16>, vector<8x384xf32> -> vector<8x384xf32>
    %179 = arith.addf %178, %10 : vector<8x384xf32>
    %180 = vector.extract_strided_slice %175 {offsets = [0, 0], sizes = [8, 256], strides = [1, 1]} : vector<8x384xf32> to vector<8x256xf32>
    %181 = vector.extract_strided_slice %179 {offsets = [0, 0], sizes = [8, 256], strides = [1, 1]} : vector<8x384xf32> to vector<8x256xf32>
    %182 = arith.addf %180, %181 : vector<8x256xf32>
    %183 = arith.negf %182 : vector<8x256xf32>
    %184 = math.exp %183 : vector<8x256xf32>
    %cst_53 = arith.constant 1.000000e+00 : f32
    %185 = vector.broadcast %cst_53 : f32 to vector<8x256xf32>
    %186 = arith.addf %185, %184 : vector<8x256xf32>
    %187 = arith.divf %185, %186 : vector<8x256xf32>
    %188 = vector.extract_strided_slice %187 {offsets = [0, 0], sizes = [8, 128], strides = [1, 1]} : vector<8x256xf32> to vector<8x128xf32>
    %189 = vector.extract_strided_slice %187 {offsets = [0, 128], sizes = [8, 128], strides = [1, 1]} : vector<8x256xf32> to vector<8x128xf32>
    %190 = vector.extract_strided_slice %175 {offsets = [0, 256], sizes = [8, 128], strides = [1, 1]} : vector<8x384xf32> to vector<8x128xf32>
    %191 = vector.extract_strided_slice %179 {offsets = [0, 256], sizes = [8, 128], strides = [1, 1]} : vector<8x384xf32> to vector<8x128xf32>
    %192 = arith.mulf %188, %191 : vector<8x128xf32>
    %193 = arith.addf %190, %192 : vector<8x128xf32>
    %194 = math.tanh %193 : vector<8x128xf32>
    %cst_54 = arith.constant 1.000000e+00 : f32
    %195 = vector.broadcast %cst_54 : f32 to vector<8x128xf32>
    %196 = arith.subf %195, %189 : vector<8x128xf32>
    %197 = arith.mulf %196, %194 : vector<8x128xf32>
    %198 = arith.mulf %189, %172 : vector<8x128xf32>
    %199 = arith.addf %197, %198 : vector<8x128xf32>
    %200 = vector.broadcast %c5_i32 : i32 to vector<8x1xi32>
    %201 = arith.cmpi slt, %200, %11 : vector<8x1xi32>
    %202 = vector.shape_cast %201 : vector<8x1xi1> to vector<8x1xi1>
    %203 = vector.broadcast %202 : vector<8x1xi1> to vector<8x128xi1>
    %204 = arith.select %203, %199, %172 : vector<8x128xi1>, vector<8x128xf32>
    %c6_i32 = arith.constant 6 : i32
    %205 = arith.index_cast %c6_i32 : i32 to index
    %c0_55 = arith.constant 0 : index
    %c0_56 = arith.constant 0 : index
    %206 = vector.load %arg10[%205, %c0_55, %c0_56] : memref<8x8x384xf32, #tpu.memory_space<vmem>>, vector<1x8x384xf32>
    %207 = vector.shape_cast %206 : vector<1x8x384xf32> to vector<8x384xf32>
    %208 = arith.truncf %204 : vector<8x128xf32> to vector<8x128xbf16>
    %c0_57 = arith.constant 0 : index
    %c0_58 = arith.constant 0 : index
    %209 = vector.load %arg4[%c0_57, %c0_58] : memref<128x384xbf16, #tpu.memory_space<vmem>>, vector<128x384xbf16>
    %cst_59 = arith.constant dense<0.000000e+00> : vector<8x384xf32>
    %210 = tpu.matmul %208, %209, %cst_59 {dimension_numbers = #tpu.dot_dimension_numbers<[1], [0], [0], [1], [0, 0, 1, 1], [], []>} : vector<8x128xbf16>, vector<128x384xbf16>, vector<8x384xf32> -> vector<8x384xf32>
    %211 = arith.addf %210, %10 : vector<8x384xf32>
    %212 = vector.extract_strided_slice %207 {offsets = [0, 0], sizes = [8, 256], strides = [1, 1]} : vector<8x384xf32> to vector<8x256xf32>
    %213 = vector.extract_strided_slice %211 {offsets = [0, 0], sizes = [8, 256], strides = [1, 1]} : vector<8x384xf32> to vector<8x256xf32>
    %214 = arith.addf %212, %213 : vector<8x256xf32>
    %215 = arith.negf %214 : vector<8x256xf32>
    %216 = math.exp %215 : vector<8x256xf32>
    %cst_60 = arith.constant 1.000000e+00 : f32
    %217 = vector.broadcast %cst_60 : f32 to vector<8x256xf32>
    %218 = arith.addf %217, %216 : vector<8x256xf32>
    %219 = arith.divf %217, %218 : vector<8x256xf32>
    %220 = vector.extract_strided_slice %219 {offsets = [0, 0], sizes = [8, 128], strides = [1, 1]} : vector<8x256xf32> to vector<8x128xf32>
    %221 = vector.extract_strided_slice %219 {offsets = [0, 128], sizes = [8, 128], strides = [1, 1]} : vector<8x256xf32> to vector<8x128xf32>
    %222 = vector.extract_strided_slice %207 {offsets = [0, 256], sizes = [8, 128], strides = [1, 1]} : vector<8x384xf32> to vector<8x128xf32>
    %223 = vector.extract_strided_slice %211 {offsets = [0, 256], sizes = [8, 128], strides = [1, 1]} : vector<8x384xf32> to vector<8x128xf32>
    %224 = arith.mulf %220, %223 : vector<8x128xf32>
    %225 = arith.addf %222, %224 : vector<8x128xf32>
    %226 = math.tanh %225 : vector<8x128xf32>
    %cst_61 = arith.constant 1.000000e+00 : f32
    %227 = vector.broadcast %cst_61 : f32 to vector<8x128xf32>
    %228 = arith.subf %227, %221 : vector<8x128xf32>
    %229 = arith.mulf %228, %226 : vector<8x128xf32>
    %230 = arith.mulf %221, %204 : vector<8x128xf32>
    %231 = arith.addf %229, %230 : vector<8x128xf32>
    %232 = vector.broadcast %c6_i32 : i32 to vector<8x1xi32>
    %233 = arith.cmpi slt, %232, %11 : vector<8x1xi32>
    %234 = vector.shape_cast %233 : vector<8x1xi1> to vector<8x1xi1>
    %235 = vector.broadcast %234 : vector<8x1xi1> to vector<8x128xi1>
    %236 = arith.select %235, %231, %204 : vector<8x128xi1>, vector<8x128xf32>
    %c7_i32 = arith.constant 7 : i32
    %237 = arith.index_cast %c7_i32 : i32 to index
    %c0_62 = arith.constant 0 : index
    %c0_63 = arith.constant 0 : index
    %238 = vector.load %arg10[%237, %c0_62, %c0_63] : memref<8x8x384xf32, #tpu.memory_space<vmem>>, vector<1x8x384xf32>
    %239 = vector.shape_cast %238 : vector<1x8x384xf32> to vector<8x384xf32>
    %240 = arith.truncf %236 : vector<8x128xf32> to vector<8x128xbf16>
    %c0_64 = arith.constant 0 : index
    %c0_65 = arith.constant 0 : index
    %241 = vector.load %arg4[%c0_64, %c0_65] : memref<128x384xbf16, #tpu.memory_space<vmem>>, vector<128x384xbf16>
    %cst_66 = arith.constant dense<0.000000e+00> : vector<8x384xf32>
    %242 = tpu.matmul %240, %241, %cst_66 {dimension_numbers = #tpu.dot_dimension_numbers<[1], [0], [0], [1], [0, 0, 1, 1], [], []>} : vector<8x128xbf16>, vector<128x384xbf16>, vector<8x384xf32> -> vector<8x384xf32>
    %243 = arith.addf %242, %10 : vector<8x384xf32>
    %244 = vector.extract_strided_slice %239 {offsets = [0, 0], sizes = [8, 256], strides = [1, 1]} : vector<8x384xf32> to vector<8x256xf32>
    %245 = vector.extract_strided_slice %243 {offsets = [0, 0], sizes = [8, 256], strides = [1, 1]} : vector<8x384xf32> to vector<8x256xf32>
    %246 = arith.addf %244, %245 : vector<8x256xf32>
    %247 = arith.negf %246 : vector<8x256xf32>
    %248 = math.exp %247 : vector<8x256xf32>
    %cst_67 = arith.constant 1.000000e+00 : f32
    %249 = vector.broadcast %cst_67 : f32 to vector<8x256xf32>
    %250 = arith.addf %249, %248 : vector<8x256xf32>
    %251 = arith.divf %249, %250 : vector<8x256xf32>
    %252 = vector.extract_strided_slice %251 {offsets = [0, 0], sizes = [8, 128], strides = [1, 1]} : vector<8x256xf32> to vector<8x128xf32>
    %253 = vector.extract_strided_slice %251 {offsets = [0, 128], sizes = [8, 128], strides = [1, 1]} : vector<8x256xf32> to vector<8x128xf32>
    %254 = vector.extract_strided_slice %239 {offsets = [0, 256], sizes = [8, 128], strides = [1, 1]} : vector<8x384xf32> to vector<8x128xf32>
    %255 = vector.extract_strided_slice %243 {offsets = [0, 256], sizes = [8, 128], strides = [1, 1]} : vector<8x384xf32> to vector<8x128xf32>
    %256 = arith.mulf %252, %255 : vector<8x128xf32>
    %257 = arith.addf %254, %256 : vector<8x128xf32>
    %258 = math.tanh %257 : vector<8x128xf32>
    %cst_68 = arith.constant 1.000000e+00 : f32
    %259 = vector.broadcast %cst_68 : f32 to vector<8x128xf32>
    %260 = arith.subf %259, %253 : vector<8x128xf32>
    %261 = arith.mulf %260, %258 : vector<8x128xf32>
    %262 = arith.mulf %253, %236 : vector<8x128xf32>
    %263 = arith.addf %261, %262 : vector<8x128xf32>
    %264 = vector.broadcast %c7_i32 : i32 to vector<8x1xi32>
    %265 = arith.cmpi slt, %264, %11 : vector<8x1xi32>
    %266 = vector.shape_cast %265 : vector<8x1xi1> to vector<8x1xi1>
    %267 = vector.broadcast %266 : vector<8x1xi1> to vector<8x128xi1>
    %268 = arith.select %267, %263, %236 : vector<8x128xi1>, vector<8x128xf32>
    %c8_i32 = arith.constant 8 : i32
    %269 = arith.truncf %268 : vector<8x128xf32> to vector<8x128xbf16>
    %c0_69 = arith.constant 0 : index
    %c0_70 = arith.constant 0 : index
    %270 = vector.load %arg7[%c0_69, %c0_70] : memref<128x128xbf16, #tpu.memory_space<vmem>>, vector<128x128xbf16>
    %cst_71 = arith.constant dense<0.000000e+00> : vector<8x128xf32>
    %271 = tpu.matmul %269, %270, %cst_71 {dimension_numbers = #tpu.dot_dimension_numbers<[1], [0], [0], [1], [0, 0, 1, 1], [], []>} : vector<8x128xbf16>, vector<128x128xbf16>, vector<8x128xf32> -> vector<8x128xf32>
    %c0_72 = arith.constant 0 : index
    %c0_73 = arith.constant 0 : index
    %272 = vector.load %arg8[%c0_72, %c0_73] : memref<1x128xf32, #tpu.memory_space<vmem>>, vector<1x128xf32>
    %273 = vector.broadcast %272 : vector<1x128xf32> to vector<8x128xf32>
    %274 = arith.addf %271, %273 : vector<8x128xf32>
    %c0_74 = arith.constant 0 : index
    %c0_75 = arith.constant 0 : index
    %275 = vector.load %arg9[%c0_74, %c0_75] : memref<8x128xf32, #tpu.memory_space<vmem>>, vector<8x128xf32>
    tpu.vector_store %arg9[%c0_74, %c0_75], %274 {strides = array<i32>} : memref<8x128xf32, #tpu.memory_space<vmem>>, vector<8x128xf32>,
    return
  }
  func.func @transform_0(%arg0: i32) -> (i32, i32) {
    %c0_i32 = arith.constant 0 : i32
    %c0_i32_0 = arith.constant 0 : i32
    %c0_i32_1 = arith.constant 0 : i32
    return %c0_i32, %c0_i32_0 : i32, i32
  }
  func.func @transform_1(%arg0: i32) -> (i32, i32) {
    %c0_i32 = arith.constant 0 : i32
    %c0_i32_0 = arith.constant 0 : i32
    %c0_i32_1 = arith.constant 0 : i32
    return %c0_i32, %c0_i32_0 : i32, i32
  }
  func.func @transform_2(%arg0: i32) -> (i32, i32) {
    %c0_i32 = arith.constant 0 : i32
    %c0_i32_0 = arith.constant 0 : i32
    %c0_i32_1 = arith.constant 0 : i32
    return %c0_i32, %c0_i32_0 : i32, i32
  }
  func.func @transform_3(%arg0: i32) -> (i32, i32) {
    %c0_i32 = arith.constant 0 : i32
    %c0_i32_0 = arith.constant 0 : i32
    %c0_i32_1 = arith.constant 0 : i32
    return %c0_i32, %c0_i32_0 : i32, i32
  }
  func.func @transform_4(%arg0: i32) -> (i32, i32) {
    %c0_i32 = arith.constant 0 : i32
    %c0_i32_0 = arith.constant 0 : i32
    %c0_i32_1 = arith.constant 0 : i32
    return %c0_i32, %c0_i32_0 : i32, i32
  }
  func.func @transform_5(%arg0: i32) -> (i32, i32) {
    %c0_i32 = arith.constant 0 : i32
    %c0_i32_0 = arith.constant 0 : i32
    %c0_i32_1 = arith.constant 0 : i32
    return %c0_i32, %c0_i32_0 : i32, i32
  }
  func.func @transform_6(%arg0: i32) -> (i32, i32) {
    %c0_i32 = arith.constant 0 : i32
    %c0_i32_0 = arith.constant 0 : i32
    %c0_i32_1 = arith.constant 0 : i32
    return %c0_i32, %c0_i32_0 : i32, i32
  }
  func.func @transform_7(%arg0: i32) -> (i32, i32) {
    %c0_i32 = arith.constant 0 : i32
    %c0_i32_0 = arith.constant 0 : i32
    %c0_i32_1 = arith.constant 0 : i32
    return %c0_i32, %c0_i32_0 : i32, i32
  }
  func.func @transform_8(%arg0: i32) -> (i32, i32) {
    %c0_i32 = arith.constant 0 : i32
    %c0_i32_0 = arith.constant 0 : i32
    %c0_i32_1 = arith.constant 0 : i32
    return %c0_i32, %c0_i32_0 : i32, i32
  }
}

</mosaic_0001>

<bundles_post_ra>
// kernel: abc_meas_emb_forward.1
= control target key start
LH: loop header
LB: loop body
LE: loop exit
PB: predicated region body
PF: predicated region fallthrough
CT: control target
= control target key end

     0   :  { %v2365_v17 = vmov 0   ;;  %vm107_vm0 = vcmask 261120   ;;  %s2356_s0 = inlined_call_operand.vmem [shape: bf16[64,32], index: 0, kind: input, shape index: {}]   ;;  %s2357_s1 = inlined_call_operand.vmem [shape: s32[8,1], index: 1, kind: input, shape index: {}]   ;;  %s2358_s2 = inlined_call_operand.vmem [shape: bf16[32,384], index: 2, kind: input, shape index: {}]   ;;  %s2359_s3 = inlined_call_operand.vmem [shape: bf16[128,384], index: 3, kind: input, shape index: {}]   ;;  %s2360_s4 = inlined_call_operand.vmem [shape: f32[1,384], index: 4, kind: input, shape index: {}]   ;;  %s2361_s5 = inlined_call_operand.vmem [shape: f32[1,384], index: 5, kind: input, shape index: {}]   ;;  %s2362_s6 = inlined_call_operand.vmem [shape: bf16[128,128], index: 6, kind: input, shape index: {}]   ;;  %s2363_s7 = inlined_call_operand.vmem [shape: f32[1,128], index: 7, kind: input, shape index: {}]   ;;  %s2364_s8 = inlined_call_operand.hbm [shape: f32[8,128], index: 8, kind: output, shape index: {}]  }
   0x1   :  { %v1311_v0 = vld [vmem:[%s2358_s2 + $0x18] sm:$0xf]  ;;  %v1494_v1 = vld [vmem:[%s2358_s2 + $0x20] sm:$0xf0]  ;;  %v1419_v2 = vld [vmem:[%s2359_s3 + $0xa8] sm:$0xf]  ;;  %1530 = vset.pattern.permute.xlu0 %v2365_v17  ;;  %1531 = vset.pattern.permute.xlu1 %v2365_v17 }
   0x2   :  { %v1312_v3 = vor.u32 %v1494_v1, %v1311_v0  ;;  %v1518_v4 = vld [vmem:[%s2359_s3 + $0xb0] sm:$0xf0]  ;;  %v1299_v5 = vld [vmem:[%s2358_s2] sm:$0xf]  ;;  %v1491_v6 = vld [vmem:[%s2358_s2 + $0x8] sm:$0xf0]  ;;  %1532 = vset.pattern.permute.xlu2 %v2365_v17 }
   0x3   :  { %v1705_v7 = vor.u32 %v1518_v4, %v1419_v2  ;;  %v1407_v8 = vld [vmem:[%s2359_s3 + $0x90] sm:$0xf]  ;;  %v1515_v9 = vld [vmem:[%s2359_s3 + $0x98] sm:$0xf0]  ;;  %v1300_v10 = vor.u32 %v1491_v6, %v1299_v5  ;;  %v1395_v12 = vld [vmem:[%s2359_s3 + $0x78] sm:$0xf] }
   0x4   :  { %126 = vmatpush.bf16.msra.mxu0 %v1312_v3  ;;  %v1714_v11 = vor.u32 %v1515_v9, %v1407_v8  ;;  %v1512_v13 = vld [vmem:[%s2359_s3 + $0x80] sm:$0xf0]  ;;  %v1427_v15 = vld [vmem:[%s2359_s3 + $0xb0] sm:$0xf]  ;;  %v1519_v16 = vld [vmem:[%s2359_s3 + $0xb8] sm:$0xf0] }
   0x5   :  { %403 = vmatpush.bf16.msra.mxu3 %v1705_v7  ;;  %v1725_v14 = vld [vmem:[%s2356_s0] sm:$0xff]  ;;  %v1735_v18 = vor.u32 %v1519_v16, %v1427_v15  ;;  %v1739_v19 = vor.u32 %v1512_v13, %v1395_v12  ;;  %v1415_v20 = vld [vmem:[%s2359_s3 + $0x98] sm:$0xf]  ;;  %v1509_v22 = vld [vmem:[%s2359_s3 + $0x68] sm:$0xf0] }
   0x6   :  { %v1383_v21 = vld [vmem:[%s2359_s3 + $0x60] sm:$0xf]  ;;  %v1516_v23 = vld [vmem:[%s2359_s3 + $0xa0] sm:$0xf0]  ;;  %v1513_v26 = vld [vmem:[%s2359_s3 + $0x88] sm:$0xf0] }
   0x7   :  { %v1756_v24 = vor.u32 %v1516_v23, %v1415_v20  ;;  %v1403_v25 = vld [vmem:[%s2359_s3 + $0x80] sm:$0xf]  ;;  %v1765_v27 = vor.u32 %v1509_v22, %v1383_v21 }
   0x8   :  { %127 = vmatpush.bf16.msra.mxu0 %v1300_v10 }
   0x9   :  { %404 = vmatpush.bf16.msra.mxu3 %v1714_v11 }
   0xb   :  { %1321 = vmatmul.msk.bf16.vlgmr.msra.gmra.mxu0 %vm107_vm0, %v1725_v14 }
   0xc   :  { %429 = vmatpush.bf16.msrb.mxu0 %v1735_v18 }
   0xd   :  { %405 = vmatpush.bf16.msra.mxu3 %v1739_v19 }
   0xe   :  { %13 = vsyncpa [#allocation4], 0  ;;  %v1371_v28 = vld [vmem:[%s2359_s3 + $0x48] sm:$0xf]  ;;  %v1506_v29 = vld [vmem:[%s2359_s3 + $0x50] sm:$0xf0]  ;;  %v1774_v30 = vor.u32 %v1513_v26, %v1403_v25 }
   0xf   :  { %v1777_v31 = vor.u32 %v1506_v29, %v1371_v28  ;;  %v1359_v32 = vld [vmem:[%s2359_s3 + $0x30] sm:$0xf]  ;;  %v1503_v33 = vld [vmem:[%s2359_s3 + $0x38] sm:$0xf0]  ;;  %v1391_v34 = vld [vmem:[%s2359_s3 + $0x68] sm:$0xf] }
  0x10   :  { %430 = vmatpush.bf16.msrb.mxu0 %v1756_v24  ;;  %v1510_v35 = vld [vmem:[%s2359_s3 + $0x70] sm:$0xf0]  ;;  %v1795_v37 = vor.u32 %v1503_v33, %v1359_v32  ;;  %v1493_v38 = vld [vmem:[%s2358_s2 + $0x1c] sm:$0xf]  ;;  %v1313_v39 = vld [vmem:[%s2358_s2 + $0x24] sm:$0xf0] }
  0x11   :  { %406 = vmatpush.bf16.msra.mxu3 %v1765_v27  ;;  %v1792_v36 = vor.u32 %v1510_v35, %v1391_v34  ;;  %v1347_v40 = vld [vmem:[%s2359_s3 + $0x18] sm:$0xf]  ;;  %v1500_v41 = vld [vmem:[%s2359_s3 + $0x20] sm:$0xf0]  ;;  %v1316_v42 = vor.u32 %v1493_v38, %v1313_v39  ;;  %v1813_v43 = vld [vmem:[%s2356_s0 + $0x8] sm:$0xff]  ;;  %s1641_s15 = smov [#allocation3]  }
  0x12   :  { %v1816_v44 = vor.u32 %v1500_v41, %v1347_v40  ;;  %v1335_v45 = vld [vmem:[%s2359_s3] sm:$0xf]  ;;  %v1490_v46 = vld [vmem:[%s2358_s2 + $0x4] sm:$0xf]  ;;  %v1301_v47 = vld [vmem:[%s2358_s2 + $0xc] sm:$0xf0] }
  0x13   :  { %155 = vmatpush.bf16.msra.mxu1 %v1316_v42  ;;  %v1497_v48 = vld [vmem:[%s2359_s3 + $0x8] sm:$0xf0]  ;;  %v1304_v49 = vor.u32 %v1490_v46, %v1301_v47  ;;  %v1379_v50 = vld [vmem:[%s2359_s3 + $0x50] sm:$0xf]  ;;  %v1507_v51 = vld [vmem:[%s2359_s3 + $0x58] sm:$0xf0] }
  0x14   :  { %431 = vmatpush.bf16.msrb.mxu0 %v1774_v30  ;;  %v1517_v52 = vld [vmem:[%s2359_s3 + $0xac] sm:$0xf]  ;;  %v1421_v53 = vld [vmem:[%s2359_s3 + $0xb4] sm:$0xf0]  ;;  %v1844_v54 = vor.u32 %v1507_v51, %v1379_v50  ;;  %v1847_v55 = vor.u32 %v1497_v48, %v1335_v45  ;;  %v1319_v57 = vld [vmem:[%s2358_s2 + $0x20] sm:$0xf] }
  0x15   :  { %407 = vmatpush.bf16.msra.mxu3 %v1777_v31  ;;  %v1850_v56 = vor.u32 %v1517_v52, %v1421_v53  ;;  %v1495_v58 = vld [vmem:[%s2358_s2 + $0x28] sm:$0xf0]  ;;  %v1367_v59 = vld [vmem:[%s2359_s3 + $0x38] sm:$0xf]  ;;  %v1514_v60 = vld [vmem:[%s2359_s3 + $0x94] sm:$0xf] }
  0x16   :  { %v1409_v61 = vld [vmem:[%s2359_s3 + $0x9c] sm:$0xf0]  ;;  %v1320_v62 = vor.u32 %v1495_v58, %v1319_v57  ;;  %v1504_v63 = vld [vmem:[%s2359_s3 + $0x40] sm:$0xf0]  ;;  %v1307_v1 = vld [vmem:[%s2358_s2 + $0x8] sm:$0xf] }
  0x17   :  { %156 = vmatpush.bf16.msra.mxu1 %v1304_v49  ;;  %v1873_v0 = vor.u32 %v1504_v63, %v1367_v59  ;;  %v1492_v2 = vld [vmem:[%s2358_s2 + $0x10] sm:$0xf0]  ;;  %v1355_v3 = vld [vmem:[%s2359_s3 + $0x20] sm:$0xf]  ;;  %v1886_v4 = vor.u32 %v1514_v60, %v1409_v61  ;;  %v1511_v5 = vld [vmem:[%s2359_s3 + $0x7c] sm:$0xf] }
  0x18   :  { %432 = vmatpush.bf16.msrb.mxu0 %v1792_v36  ;;  %184 = vmatpush.bf16.msra.mxu2 %v1320_v62  ;;  %v1308_v6 = vor.u32 %v1492_v2, %v1307_v1  ;;  %v1501_v8 = vld [vmem:[%s2359_s3 + $0x28] sm:$0xf0]  ;;  %v1397_v9 = vld [vmem:[%s2359_s3 + $0x84] sm:$0xf0]  ;;  %v1498_v13 = vld [vmem:[%s2359_s3 + $0x10] sm:$0xf0] }
  0x19   :  { %408 = vmatpush.bf16.msra.mxu3 %v1795_v37  ;;  %v1898_v10 = vor.u32 %v1501_v8, %v1355_v3  ;;  %v1343_v12 = vld [vmem:[%s2359_s3 + $0x8] sm:$0xf]  ;;  %v1909_v15 = vor.u32 %v1511_v5, %v1397_v9  ;;  %v1917_v20 = vld [vmem:[%s2356_s0 + $0x10] sm:$0xff]  ;;  %v1508_v21 = vld [vmem:[%s2359_s3 + $0x64] sm:$0xf]  ;;  %s1270_s16 = sshll.u32 %s1641_s15, 4  ;;  %s1271_s16 = int_to_ptr.vmem [resolvable:$true] %s1270_s16 }
  0x1a   :  { %1325 = vmatmul.msk.bf16.vlgmr.msra.gmra.mxu1 %vm107_vm0, %v1725_v14  ;;  %v1912_v16 = vor.u32 %v1498_v13, %v1343_v12  ;;  %v1385_v22 = vld [vmem:[%s2359_s3 + $0x6c] sm:$0xf0]  ;;  %v1505_v25 = vld [vmem:[%s2359_s3 + $0x4c] sm:$0xf]  ;;  %v1373_v26 = vld [vmem:[%s2359_s3 + $0x54] sm:$0xf0] }
  0x1b   :  { %1322 = vmatmul.msk.bf16.gmra.mxu0 %vm107_vm0, %v1813_v43  ;;  %501 = vmatpush.bf16.msrb.mxu1 %v1705_v7  ;;  %v1930_v23 = vor.u32 %v1508_v21, %v1385_v22  ;;  %v1952_v29 = vor.u32 %v1505_v25, %v1373_v26  ;;  %v1502_v32 = vld [vmem:[%s2359_s3 + $0x34] sm:$0xf]  ;;  %v1361_v33 = vld [vmem:[%s2359_s3 + $0x3c] sm:$0xf0]  ;;  %v1499_v35 = vld [vmem:[%s2359_s3 + $0x1c] sm:$0xf] }
  0x1c   :  { %433 = vmatpush.bf16.msrb.mxu0 %v1844_v54  ;;  %185 = vmatpush.bf16.msra.mxu2 %v1308_v6  ;;  %v1967_v34 = vor.u32 %v1502_v32, %v1361_v33  ;;  %v1349_v38 = vld [vmem:[%s2359_s3 + $0x24] sm:$0xf0]  ;;  %v1489_v41 = vld [vmem:[%s2356_s0 + $0x18] sm:$0xff]  ;;  %v1496_v42 = vld [vmem:[%s2359_s3 + $0x4] sm:$0xf]  ;;  %s1272_s19 = sshll.u32 %s2364_s8, 4  ;;  %s1273_s19 = int_to_ptr.hbm [resolvable:$true] %s1272_s19 }
  0x1d   :  { %409 = vmatpush.bf16.msra.mxu3 %v1816_v44  ;;  %v1980_v40 = vor.u32 %v1499_v35, %v1349_v38  ;;  %v1337_v45 = vld [vmem:[%s2359_s3 + $0xc] sm:$0xf0]  ;;  %v47_v48 = vld [vmem:[%s2360_s4] sm:$0x7] }
  0x1e   :  { %v1998_v46 = vor.u32 %v1496_v42, %v1337_v45  ;;  %v49_v49 = vperm.slane %v47_v48, 0  ;;  %v231_v59 = vld [vmem:[%s2361_s5] sm:$0x7]  ;;  %v2080_v22 = vperm.slane %v47_v48, 1 }
  0x1f   :  { %502 = vmatpush.bf16.msrb.mxu1 %v1714_v11  ;;  %1329 = vmatmul.msk.bf16.vlgmr.msra.gmra.mxu2 %vm107_vm0, %v1725_v14  ;;  %v1944_v14 = vld [vmem:[%s2357_s1] sm:$0xff]  ;;  %v2071_v60 = vperm.slane %v231_v59, 0  ;;  %v2084_v32 = vperm.slane %v231_v59, 1 }
  0x20   :  { %434 = vmatpush.bf16.msrb.mxu0 %v1873_v0  ;;  %514 = vmatpush.bf16.msrb.mxu2 %v1850_v56  ;;  %vm489_vm1 = vcmp.gt.s32.totalorder %v1944_v14, 0  ;;  %vm587_vm2 = vcmp.gt.s32.totalorder %v1944_v14, 1  ;;  %vm1077_vm3 = vcmp.gt.s32.totalorder %v1944_v14, 6  ;;  %vm685_vm14 = vcmp.gt.s32.totalorder %v1944_v14, 2 }
  0x21   :  { %410 = vmatpush.bf16.msra.mxu3 %v1847_v55  ;;  %v490_v28 = vsel %vm489_vm1, 1, %v2365_v17  ;;  %v588_v39 = vsel %vm587_vm2, 1, %v2365_v17  ;;  %v1078_v47 = vsel %vm1077_vm3, 1, %v2365_v17  ;;  %vm783_vm15 = vcmp.gt.s32.totalorder %v1944_v14, 3 }
  0x22   :  { %492 = vperm.xlu0 %1530, %v490_v28  }
  0x23   :  { %503 = vmatpush.bf16.msrb.mxu1 %v1739_v19 }
  0x24   :  { %411 = vmatmul.bf16.vlgmr.msra.gmra.mxu3 %v2365_v17  ;;  %435 = vmatpush.bf16.msrb.mxu0 %v1898_v10 }
  0x25   :  { %416 = vmatpush.bf16.msrb.mxu3 %v1850_v56  ;;  %515 = vmatpush.bf16.msrb.mxu2 %v1886_v4 }
  0x27   :  { %504 = vmatpush.bf16.msrb.mxu1 %v1765_v27 }
  0x28   :  { %436 = vmatpush.bf16.msrb.mxu0 %v1912_v16 }
  0x29   :  { %417 = vmatpush.bf16.msrb.mxu3 %v1886_v4  ;;  %516 = vmatpush.bf16.msrb.mxu2 %v1909_v15 }
  0x2a   :  { %1326 = vmatmul.msk.bf16.gmra.mxu1 %vm107_vm0, %v1813_v43  ;;  %590 = vperm.xlu0 %1530, %v588_v39  }
  0x2b   :  { %1323 = vmatmul.msk.bf16.gmra.mxu0 %vm107_vm0, %v1917_v20  ;;  %505 = vmatpush.bf16.msrb.mxu1 %v1777_v31 }
  0x2c   :  { %599 = vmatpush.bf16.msra.mxu0 %v1705_v7 }
  0x2d   :  { %418 = vmatpush.bf16.msrb.mxu3 %v1909_v15  ;;  %517 = vmatpush.bf16.msrb.mxu2 %v1930_v23 }
  0x2f   :  { %506 = vmatpush.bf16.msrb.mxu1 %v1795_v37  ;;  %1330 = vmatmul.msk.bf16.gmra.mxu2 %vm107_vm0, %v1813_v43 }
  0x30   :  { %600 = vmatpush.bf16.msra.mxu0 %v1714_v11 }
  0x31   :  { %419 = vmatpush.bf16.msrb.mxu3 %v1930_v23  ;;  %518 = vmatpush.bf16.msrb.mxu2 %v1952_v29 }
  0x32   :  { %1080 = vperm.xlu0 %1530, %v1078_v47  }
  0x33   :  { %507 = vmatpush.bf16.msrb.mxu1 %v1816_v44 }
  0x34   :  { %601 = vmatpush.bf16.msra.mxu0 %v1739_v19 }
  0x35   :  { %420 = vmatpush.bf16.msrb.mxu3 %v1952_v29  ;;  %519 = vmatpush.bf16.msrb.mxu2 %v1967_v34 }
  0x37   :  { %508 = vmatpush.bf16.msrb.mxu1 %v1847_v55 }
  0x38   :  { %602 = vmatpush.bf16.msra.mxu0 %v1765_v27 }
  0x39   :  { %421 = vmatpush.bf16.msrb.mxu3 %v1967_v34  ;;  %520 = vmatpush.bf16.msrb.mxu2 %v1980_v40 }
  0x3a   :  { %1327 = vmatmul.msk.bf16.gmra.mxu1 %vm107_vm0, %v1917_v20 }
  0x3b   :  { %1324 = vmatmul.msk.bf16.gmra.mxu0 %vm107_vm0, %v1489_v41  ;;  %612 = vmatpush.bf16.msra.mxu1 %v1850_v56 }
  0x3c   :  { %603 = vmatpush.bf16.msra.mxu0 %v1777_v31 }
  0x3d   :  { %422 = vmatpush.bf16.msrb.mxu3 %v1980_v40  ;;  %521 = vmatpush.bf16.msrb.mxu2 %v1998_v46 }
  0x3f   :  { %613 = vmatpush.bf16.msra.mxu1 %v1886_v4  ;;  %1331 = vmatmul.msk.bf16.gmra.mxu2 %vm107_vm0, %v1917_v20 }
  0x40   :  { %604 = vmatpush.bf16.msra.mxu0 %v1795_v37 }
  0x41   :  { %423 = vmatpush.bf16.msrb.mxu3 %v1998_v46  ;;  %625 = vmatpush.bf16.msra.mxu2 %v1735_v18 }
  0x43   :  { %614 = vmatpush.bf16.msra.mxu1 %v1909_v15 }
  0x44   :  { %424 = vmatmul.bf16.vlgmr.msrb.gmra.mxu3 %v2365_v17  ;;  %605 = vmatpush.bf16.msra.mxu0 %v1816_v44 }
  0x45   :  { %527 = vmatpush.bf16.msra.mxu3 %v1735_v18  ;;  %626 = vmatpush.bf16.msra.mxu2 %v1756_v24 }
  0x47   :  { %615 = vmatpush.bf16.msra.mxu1 %v1930_v23 }
  0x48   :  { %606 = vmatpush.bf16.msra.mxu0 %v1847_v55 }
  0x49   :  { %528 = vmatpush.bf16.msra.mxu3 %v1756_v24  ;;  %627 = vmatpush.bf16.msra.mxu2 %v1774_v30 }
  0x4a   :  { %1328 = vmatmul.msk.bf16.gmra.mxu1 %vm107_vm0, %v1489_v41 }
  0x4b   :  { %437 = vmatmul.bf16.vlgmr.msrb.gmra.mxu0 %v2365_v17  ;;  %616 = vmatpush.bf16.msra.mxu1 %v1952_v29 }
  0x4c   :  { %710 = vmatpush.bf16.msrb.mxu0 %v1850_v56 }
  0x4d   :  { %529 = vmatpush.bf16.msra.mxu3 %v1774_v30  ;;  %628 = vmatpush.bf16.msra.mxu2 %v1792_v36 }
  0x4f   :  { %617 = vmatpush.bf16.msra.mxu1 %v1967_v34  ;;  %1332 = vmatmul.msk.bf16.gmra.mxu2 %vm107_vm0, %v1489_v41 }
  0x50   :  { %711 = vmatpush.bf16.msrb.mxu0 %v1886_v4 }
  0x51   :  { %530 = vmatpush.bf16.msra.mxu3 %v1792_v36  ;;  %629 = vmatpush.bf16.msra.mxu2 %v1844_v54 }
  0x53   :  { %618 = vmatpush.bf16.msra.mxu1 %v1980_v40 }
  0x54   :  { %712 = vmatpush.bf16.msrb.mxu0 %v1909_v15 }
  0x55   :  { %531 = vmatpush.bf16.msra.mxu3 %v1844_v54  ;;  %630 = vmatpush.bf16.msra.mxu2 %v1873_v0 }
  0x57   :  { %619 = vmatpush.bf16.msra.mxu1 %v1998_v46 }
  0x58   :  { %713 = vmatpush.bf16.msrb.mxu0 %v1930_v23 }
  0x59   :  { %532 = vmatpush.bf16.msra.mxu3 %v1873_v0  ;;  %631 = vmatpush.bf16.msra.mxu2 %v1898_v10 }
  0x5c   :  { %714 = vmatpush.bf16.msrb.mxu0 %v1952_v29 }
  0x5d   :  { %533 = vmatpush.bf16.msra.mxu3 %v1898_v10  ;;  %632 = vmatpush.bf16.msra.mxu2 %v1912_v16 }
  0x60   :  { %715 = vmatpush.bf16.msrb.mxu0 %v1967_v34 }
  0x61   :  { %534 = vmatpush.bf16.msra.mxu3 %v1912_v16 }
  0x64   :  { %716 = vmatpush.bf16.msrb.mxu0 %v1980_v40 }
  0x65   :  { %697 = vmatpush.bf16.msrb.mxu3 %v1705_v7 }
  0x68   :  { %717 = vmatpush.bf16.msrb.mxu0 %v1998_v46 }
  0x69   :  { %698 = vmatpush.bf16.msrb.mxu3 %v1714_v11 }
  0x6d   :  { %699 = vmatpush.bf16.msrb.mxu3 %v1739_v19 }
  0x71   :  { %700 = vmatpush.bf16.msrb.mxu3 %v1765_v27 }
  0x75   :  { %701 = vmatpush.bf16.msrb.mxu3 %v1777_v31 }
  0x79   :  { %702 = vmatpush.bf16.msrb.mxu3 %v1795_v37 }
  0x7d   :  { %703 = vmatpush.bf16.msrb.mxu3 %v1816_v44 }
  0x81   :  { %704 = vmatpush.bf16.msrb.mxu3 %v1847_v55 }
  0x88   :  { %v129_v43 = vpop.f32.mrf.mxu0 }
  0x89   :  { %v130_v62 = vadd.f32 %v129_v43, %v49_v49 }
  0x90   :  { %v131_v50 = vpop.f32.mrf.mxu0 }
  0x91   :  { %v2062_v51 = vadd.f32 %v131_v50, %v49_v49 }
  0x97   :  { %v158_v33 = vpop.f32.mrf.mxu1 }
  0x98   :  { %v134_v52 = vpop.f32.mrf.mxu0  ;;  %v159_v35 = vadd.f32 %v158_v33, %v2080_v22 }
  0x99   :  { %v2064_v53 = vadd.f32 %v134_v52, %v49_v49 }
  0xa0   :  { %v136_v57 = vpop.f32.mrf.mxu0 }
  0xa1   :  { %v2066_v58 = vadd.f32 %v136_v57, %v49_v49  ;;  %v2088_v57 = vperm.slane %v231_v59, 2 }
  0xa7   :  { %v412_v61 = vpop.f32.mrf.mxu3 }
  0xa8   :  { %v413_v63 = vadd.f32 %v412_v61, %v2071_v60  ;;  %v139_v1 = vpop.f32.mrf.mxu0 }
  0xa9   :  { %v2074_v2 = vadd.f32 %v139_v1, %v49_v49 }
  0xaa   :  { %v442_v3 = vadd.f32 %v413_v63, %v130_v62 }
  0xac   :  { %v1429_v5 = vmul.f32 -1.442695, %v442_v3 }
  0xae   :  { %1534 = vpow2.f32 %v1429_v5 }
  0xaf   :  { %v414_v6 = vpop.f32.mrf.mxu3 }
  0xb0   :  { %v141_v8 = vpop.f32.mrf.mxu0 }
  0xb1   :  { %v2076_v9 = vadd.f32 %v141_v8, %v49_v49  ;;  %v2091_v8 = vperm.slane %v47_v48, 2 }
  0xb4   :  { %v1535_v12 = vpop.eup %1534 }
  0xb5   :  { %v450_v13 = vadd.f32 1.0, %v1535_v12 }
  0xb7   :  { %1536 = vrcp.f32 %v450_v13  ;;  %v463_v63 = vand.u32 2147483648, %v450_v13  ;;  %vm457_vm5 = vweird.f32 %v450_v13  ;;  %v461_v3 = vand.u32 2147483647, %v450_v13 }
  0xb8   :  { %v144_v20 = vpop.f32.mrf.mxu0 }
  0xb9   :  { %v2078_v21 = vadd.f32 %v144_v20, %v49_v49  ;;  %v464_v12 = vor.u32 1.1754944e-38, %v463_v63  ;;  %v187_v20 = vpop.f32.mrf.mxu2  ;;  %vm462_vm7 = vcmp.eq.f32.partialorder %v461_v3, 8.507059e+37 }
  0xba   :  { %v188_v33 = vadd.f32 %v187_v20, %v2091_v8 }
  0xbb   :  { %2367 = vst [vmem:[#allocation6_spill] sm:$0xff] %v2078_v21 }
  0xbd   :  { %v1537_v26 = vpop.eup %1536 }
  0xbe   :  { %v453_v39 = vmul.f32 %v1537_v26, %v450_v13  ;;  %vm458_vm4 = vweird.f32 %v1537_v26 }
  0xbf   :  { %vm459_vm6 = vmor %vm457_vm5, %vm458_vm4  ;;  %vm1175_vm4 = vcmp.gt.s32.totalorder %v1944_v14, 7 }
  0xc0   :  { %v146_v25 = vpop.f32.mrf.mxu0  ;;  %v454_v47 = vsub.f32 1.0, %v453_v39 }
  0xc1   :  { %v2082_v28 = vadd.f32 %v146_v25, %v49_v49 }
  0xc2   :  { %v455_v50 = vmul.f32 %v1537_v26, %v454_v47 }
  0xc3   :  { %2368 = vst [vmem:[#allocation7_spill] sm:$0xff] %v2082_v28 }
  0xc4   :  { %v456_v49 = vadd.f32 %v1537_v26, %v455_v50 }
  0xc6   :  { %v460_v6 = vsel %vm459_vm6, %v1537_v26, %v456_v49  ;;  %v493_v49 = vpop.permute.xlu0 %492 }
  0xc7   :  { %v425_v38 = vpop.f32.mrf.mxu3  ;;  %v465_v59 = vsel %vm462_vm7, %v464_v12, %v460_v6  ;;  %vm494_vm12 = vcmp.eq.s32.totalorder %v493_v49, 1  ;;  %v189_v6 = vpop.f32.mrf.mxu2 }
  0xc8   :  { %v426_v41 = vadd.f32 %v425_v38, %v2084_v32  ;;  %v438_v45 = vpop.f32.mrf.mxu0  ;;  %vm1431_vm13 = vmpackc.low %vm494_vm12, %vm494_vm12 }
  0xc9   :  { %v439_v5 = vadd.f32 %v438_v45, %v2088_v57 }
  0xca   :  { %v443_v42 = vadd.f32 %v426_v41, %v159_v35 }
  0xcb   :  { %v482_v25 = vmul.f32 %v465_v59, %v439_v5 }
  0xcc   :  { %v1430_v43 = vmul.f32 -1.442695, %v443_v42 }
  0xcd   :  { %v483_v39 = vadd.f32 %v482_v25, %v188_v33 }
  0xce   :  { %1538 = vpow2.f32 %v1430_v43 }
  0xcf   :  { %v427_v52 = vpop.f32.mrf.mxu3  ;;  %v2122_v20 = vpop.f32.mrf.mxu2 }
  0xd0   :  { %v440_v61 = vpop.f32.mrf.mxu0 }
  0xd4   :  { %v1539_v62 = vpop.eup %1538 }
  0xd5   :  { %v451_v1 = vadd.f32 1.0, %v1539_v62 }
  0xd7   :  { %1540 = vrcp.f32 %v451_v1  ;;  %v478_v42 = vand.u32 2147483648, %v451_v1  ;;  %v476_v47 = vand.u32 2147483647, %v451_v1  ;;  %vm472_vm9 = vweird.f32 %v451_v1  ;;  %v2126_v25 = vpop.f32.mrf.mxu2 }
  0xd8   :  { %1542 = vtanh.f32 %v483_v39 }
  0xd9   :  { %v479_v48 = vor.u32 1.1754944e-38, %v478_v42  ;;  %vm477_vm11 = vcmp.eq.f32.partialorder %v476_v47, 8.507059e+37 }
  0xdd   :  { %v1541_v35 = vpop.eup %1540 }
  0xde   :  { %v468_v38 = vmul.f32 %v1541_v35, %v451_v1  ;;  %vm473_vm8 = vweird.f32 %v1541_v35  ;;  %v1543_v52 = vpop.eup %1542  ;;  %v160_v1 = vpop.f32.mrf.mxu1 }
  0xdf   :  { %vm474_vm10 = vmor %vm472_vm9, %vm473_vm8 }
  0xe0   :  { %v469_v41 = vsub.f32 1.0, %v468_v38 }
  0xe2   :  { %v470_v13 = vmul.f32 %v1541_v35, %v469_v41 }
  0xe4   :  { %v471_v45 = vadd.f32 %v1541_v35, %v470_v13 }
  0xe6   :  { %v475_v26 = vsel %vm474_vm10, %v1541_v35, %v471_v45  ;;  %v2120_v12 = vpop.f32.mrf.mxu1  ;;  %v2130_v35 = vpop.f32.mrf.mxu2 }
  0xe7   :  { %v480_v43 = vsel %vm477_vm11, %v479_v48, %v475_v26 }
  0xe8   :  { %v485_v50 = vsub.f32 1.0, %v480_v43  ;;  %v487_v62 = vmul.f32 0.0, %v480_v43 }
  0xea   :  { %v486_v61 = vmul.f32 %v1543_v52, %v485_v50  ;;  %v161_v52 = vadd.f32 %v160_v1, %v2080_v22 }
  0xec   :  { %v488_v63 = vadd.f32 %v487_v62, %v486_v61 }
  0xee   :  { %v2094_v3 = vsel %vm494_vm12, %v488_v63, 0.0  ;;  %v1432_v5 = vpack.c.bf16 %v488_v63, %v488_v63  ;;  %v2124_v59 = vpop.f32.mrf.mxu1  ;;  %v2134_v39 = vpop.f32.mrf.mxu2 }
  0xef   :  { %2370 = vst [vmem:[#allocation9_spill] sm:$0xff] %v2134_v39 }
  0xf0   :  { %1433 = vmatmul.msk.bf16.vlgmr.msrb.gmra.mxu1 %vm1431_vm13, %v1432_v5  ;;  %1436 = vmatmul.msk.bf16.vlgmr.msrb.gmra.mxu2 %vm1431_vm13, %v1432_v5 }
  0xf1   :  { %1439 = vmatmul.msk.bf16.vlgmr.msra.gmra.mxu3 %vm1431_vm13, %v1432_v5  ;;  %723 = vmatpush.bf16.msrb.mxu1 %v1735_v18 }
  0xf2   :  { %795 = vmatpush.bf16.msrb.mxu2 %v1705_v7  ;;  %808 = vmatpush.bf16.msra.mxu3 %v1850_v56 }
  0xf5   :  { %724 = vmatpush.bf16.msrb.mxu1 %v1756_v24 }
  0xf6   :  { %796 = vmatpush.bf16.msrb.mxu2 %v1714_v11  ;;  %809 = vmatpush.bf16.msra.mxu3 %v1886_v4  ;;  %v2128_v33 = vpop.f32.mrf.mxu1  ;;  %v2138_v42 = vpop.f32.mrf.mxu2 }
  0xf7   :  { %2372 = vst [vmem:[#allocation11_spill] sm:$0xff] %v2138_v42 }
  0xf9   :  { %725 = vmatpush.bf16.msrb.mxu1 %v1774_v30 }
  0xfa   :  { %797 = vmatpush.bf16.msrb.mxu2 %v1739_v19  ;;  %810 = vmatpush.bf16.msra.mxu3 %v1909_v15 }
  0xfd   :  { %726 = vmatpush.bf16.msrb.mxu1 %v1792_v36 }
  0xfe   :  { %798 = vmatpush.bf16.msrb.mxu2 %v1765_v27  ;;  %811 = vmatpush.bf16.msra.mxu3 %v1930_v23  ;;  %v2132_v38 = vpop.f32.mrf.mxu1  ;;  %v2142_v47 = vpop.f32.mrf.mxu2 }
  0xff   :  { %2369 = vst [vmem:[#allocation8_spill] sm:$0xff] %v2132_v38 }
 0x100   :  { %2374 = vst [vmem:[#allocation13_spill] sm:$0xff] %v2142_v47 }
 0x101   :  { %727 = vmatpush.bf16.msrb.mxu1 %v1844_v54 }
 0x102   :  { %799 = vmatpush.bf16.msrb.mxu2 %v1777_v31  ;;  %812 = vmatpush.bf16.msra.mxu3 %v1952_v29 }
 0x105   :  { %728 = vmatpush.bf16.msrb.mxu1 %v1873_v0 }
 0x106   :  { %800 = vmatpush.bf16.msrb.mxu2 %v1795_v37  ;;  %813 = vmatpush.bf16.msra.mxu3 %v1967_v34  ;;  %v2136_v41 = vpop.f32.mrf.mxu1 }
 0x107   :  { %2371 = vst [vmem:[#allocation10_spill] sm:$0xff] %v2136_v41 }
 0x109   :  { %729 = vmatpush.bf16.msrb.mxu1 %v1898_v10 }
 0x10a   :  { %801 = vmatpush.bf16.msrb.mxu2 %v1816_v44  ;;  %814 = vmatpush.bf16.msra.mxu3 %v1980_v40 }
 0x10d   :  { %730 = vmatpush.bf16.msrb.mxu1 %v1912_v16 }
 0x10e   :  { %802 = vmatpush.bf16.msrb.mxu2 %v1847_v55  ;;  %815 = vmatpush.bf16.msra.mxu3 %v1998_v46  ;;  %v2140_v13 = vpop.f32.mrf.mxu1 }
 0x10f   :  { %2373 = vst [vmem:[#allocation12_spill] sm:$0xff] %v2140_v13 }
 0x16d   :  { %v510_v45 = vpop.f32.mrf.mxu1 }
 0x16e   :  { %v511_v48 = vadd.f32 %v510_v45, %v2071_v60 }
 0x170   :  { %v540_v26 = vadd.f32 %v511_v48, %v2062_v51  ;;  %v2375_v51 = vmov 0  }
 0x171   :  { %v686_v48 = vsel %vm685_vm14, 1, %v2375_v51 }
 0x172   :  { %v1440_v43 = vmul.f32 -1.442695, %v540_v26  ;;  %688 = vperm.xlu1 %1531, %v686_v48  }
 0x173   :  { %v523_v50 = vpop.f32.mrf.mxu2 }
 0x174   :  { %1544 = vpow2.f32 %v1440_v43  ;;  %v524_v49 = vadd.f32 %v523_v50, %v2084_v32  ;;  %v536_v61 = vpop.f32.mrf.mxu3 }
 0x175   :  { %v512_v62 = vpop.f32.mrf.mxu1 }
 0x176   :  { %v541_v63 = vadd.f32 %v524_v49, %v161_v52 }
 0x178   :  { %v1441_v5 = vmul.f32 -1.442695, %v541_v63 }
 0x17a   :  { %v1545_v17 = vpop.eup %1544  ;;  %1546 = vpow2.f32 %v1441_v5 }
 0x17b   :  { %v548_v28 = vadd.f32 1.0, %v1545_v17  ;;  %v525_v47 = vpop.f32.mrf.mxu2 }
 0x17c   :  { %v538_v13 = vpop.f32.mrf.mxu3 }
 0x17d   :  { %1548 = vrcp.f32 %v548_v28  ;;  %v561_v50 = vand.u32 2147483648, %v548_v28  ;;  %v559_v17 = vand.u32 2147483647, %v548_v28  ;;  %v784_v13 = vsel %vm783_vm15, 1, %v2375_v51 }
 0x17e   :  { %vm555_vm1 = vweird.f32 %v548_v28  ;;  %786 = vperm.xlu1 %1531, %v784_v13  }
 0x17f   :  { %v562_v63 = vor.u32 1.1754944e-38, %v561_v50  ;;  %vm560_vm3 = vcmp.eq.f32.partialorder %v559_v17, 8.507059e+37  ;;  %v1176_v50 = vsel %vm1175_vm4, 1, %v2375_v51  ;;  %vm979_vm4 = vcmp.gt.s32.totalorder %v1944_v14, 5 }
 0x180   :  { %v1547_v45 = vpop.eup %1546 }
 0x181   :  { %v549_v42 = vadd.f32 1.0, %v1547_v45  ;;  %v537_v45 = vadd.f32 %v536_v61, %v2088_v57 }
 0x183   :  { %v1549_v1 = vpop.eup %1548  ;;  %1550 = vrcp.f32 %v549_v42  ;;  %v576_v21 = vand.u32 2147483648, %v549_v42  ;;  %v574_v39 = vand.u32 2147483647, %v549_v42  ;;  %vm570_vm6 = vweird.f32 %v549_v42 }
 0x184   :  { %v551_v26 = vmul.f32 %v1549_v1, %v548_v28  ;;  %vm556_vm0 = vweird.f32 %v1549_v1 }
 0x185   :  { %vm557_vm2 = vmor %vm555_vm1, %vm556_vm0  ;;  %v577_v13 = vor.u32 1.1754944e-38, %v576_v21  ;;  %vm575_vm8 = vcmp.eq.f32.partialorder %v574_v39, 8.507059e+37  ;;  %v164_v39 = vadd.f32 %v2120_v12, %v2080_v22 }
 0x186   :  { %v552_v43 = vsub.f32 1.0, %v551_v26  ;;  %v190_v26 = vadd.f32 %v189_v6, %v2091_v8  ;;  %1178 = vperm.xlu1 %1531, %v1176_v50  }
 0x188   :  { %v553_v52 = vmul.f32 %v1549_v1, %v552_v43 }
 0x189   :  { %v1551_v47 = vpop.eup %1550 }
 0x18a   :  { %v566_v49 = vmul.f32 %v1551_v47, %v549_v42  ;;  %v554_v62 = vadd.f32 %v1549_v1, %v553_v52  ;;  %vm571_vm5 = vweird.f32 %v1551_v47 }
 0x18b   :  { %vm572_vm7 = vmor %vm570_vm6, %vm571_vm5 }
 0x18c   :  { %v567_v5 = vsub.f32 1.0, %v566_v49  ;;  %v558_v48 = vsel %vm557_vm2, %v1549_v1, %v554_v62 }
 0x18d   :  { %v563_v43 = vsel %vm560_vm3, %v562_v63, %v558_v48  ;;  %v591_v63 = vpop.permute.xlu0 %590  ;;  %vm881_vm3 = vcmp.gt.s32.totalorder %v1944_v14, 4 }
 0x18e   :  { %v568_v41 = vmul.f32 %v1551_v47, %v567_v5  ;;  %v580_v38 = vmul.f32 %v563_v43, %v537_v45  ;;  %vm592_vm9 = vcmp.eq.s32.totalorder %v591_v63, 1 }
 0x190   :  { %v569_v28 = vadd.f32 %v1551_v47, %v568_v41  ;;  %v581_v52 = vadd.f32 %v580_v38, %v190_v26 }
 0x192   :  { %v573_v61 = vsel %vm572_vm7, %v1551_v47, %v569_v28  ;;  %1552 = vtanh.f32 %v581_v52 }
 0x193   :  { %v578_v1 = vsel %vm575_vm8, %v577_v13, %v573_v61 }
 0x194   :  { %v585_v6 = vmul.f32 %v578_v1, %v2094_v3  ;;  %v583_v17 = vsub.f32 1.0, %v578_v1 }
 0x198   :  { %v1553_v49 = vpop.eup %1552 }
 0x199   :  { %v584_v62 = vmul.f32 %v1553_v49, %v583_v17 }
 0x19b   :  { %v586_v5 = vadd.f32 %v585_v6, %v584_v62 }
 0x19d   :  { %v2158_v41 = vsel %vm592_vm9, %v586_v5, %v2094_v3 }
 0x19e   :  { %v598_v38 = vpack.c.bf16 %v2158_v41, %v2158_v41 }
 0x1a0   :  { %607 = vmatmul.bf16.vlgmr.msra.gmra.mxu0 %v598_v38  ;;  %620 = vmatmul.bf16.vlgmr.msra.gmra.mxu1 %v598_v38 }
 0x1a1   :  { %633 = vmatmul.bf16.vlgmr.msra.gmra.mxu2 %v598_v38  ;;  %821 = vmatpush.bf16.msra.mxu0 %v1735_v18 }
 0x1a2   :  { %893 = vmatpush.bf16.msra.mxu1 %v1705_v7  ;;  %906 = vmatpush.bf16.msra.mxu2 %v1850_v56 }
 0x1a5   :  { %822 = vmatpush.bf16.msra.mxu0 %v1756_v24 }
 0x1a6   :  { %894 = vmatpush.bf16.msra.mxu1 %v1714_v11  ;;  %907 = vmatpush.bf16.msra.mxu2 %v1886_v4 }
 0x1a9   :  { %823 = vmatpush.bf16.msra.mxu0 %v1774_v30 }
 0x1aa   :  { %895 = vmatpush.bf16.msra.mxu1 %v1739_v19  ;;  %908 = vmatpush.bf16.msra.mxu2 %v1909_v15 }
 0x1ad   :  { %824 = vmatpush.bf16.msra.mxu0 %v1792_v36 }
 0x1ae   :  { %896 = vmatpush.bf16.msra.mxu1 %v1765_v27  ;;  %909 = vmatpush.bf16.msra.mxu2 %v1930_v23 }
 0x1b1   :  { %825 = vmatpush.bf16.msra.mxu0 %v1844_v54 }
 0x1b2   :  { %897 = vmatpush.bf16.msra.mxu1 %v1777_v31  ;;  %910 = vmatpush.bf16.msra.mxu2 %v1952_v29 }
 0x1b5   :  { %826 = vmatpush.bf16.msra.mxu0 %v1873_v0 }
 0x1b6   :  { %898 = vmatpush.bf16.msra.mxu1 %v1795_v37  ;;  %911 = vmatpush.bf16.msra.mxu2 %v1967_v34 }
 0x1b9   :  { %827 = vmatpush.bf16.msra.mxu0 %v1898_v10 }
 0x1ba   :  { %899 = vmatpush.bf16.msra.mxu1 %v1816_v44  ;;  %912 = vmatpush.bf16.msra.mxu2 %v1980_v40 }
 0x1bd   :  { %828 = vmatpush.bf16.msra.mxu0 %v1912_v16 }
 0x1be   :  { %900 = vmatpush.bf16.msra.mxu1 %v1847_v55  ;;  %913 = vmatpush.bf16.msra.mxu2 %v1998_v46 }
 0x21d   :  { %v608_v21 = vpop.f32.mrf.mxu0  ;;  %v621_v3 = vpop.f32.mrf.mxu1 }
 0x21e   :  { %v609_v42 = vadd.f32 %v608_v21, %v2071_v60  ;;  %v622_v47 = vadd.f32 %v621_v3, %v2084_v32 }
 0x220   :  { %v638_v45 = vadd.f32 %v609_v42, %v2064_v53  ;;  %v639_v48 = vadd.f32 %v622_v47, %v164_v39 }
 0x222   :  { %v1442_v26 = vmul.f32 -1.442695, %v638_v45  ;;  %v1443_v43 = vmul.f32 -1.442695, %v639_v48 }
 0x224   :  { %1554 = vpow2.f32 %v1442_v26  ;;  %v634_v28 = vpop.f32.mrf.mxu2 }
 0x225   :  { %1556 = vpow2.f32 %v1443_v43  ;;  %v610_v52 = vpop.f32.mrf.mxu0  ;;  %v623_v50 = vpop.f32.mrf.mxu1  ;;  %v635_v45 = vadd.f32 %v634_v28, %v2088_v57 }
 0x226   :  { %v193_v52 = vadd.f32 %v2122_v20, %v2091_v8 }
 0x22a   :  { %v1555_v13 = vpop.eup %1554 }
 0x22b   :  { %v1557_v61 = vpop.eup %1556  ;;  %v646_v1 = vadd.f32 1.0, %v1555_v13 }
 0x22c   :  { %v647_v6 = vadd.f32 1.0, %v1557_v61  ;;  %v636_v17 = vpop.f32.mrf.mxu2 }
 0x22d   :  { %1558 = vrcp.f32 %v646_v1  ;;  %v659_v38 = vand.u32 2147483648, %v646_v1  ;;  %v657_v3 = vand.u32 2147483647, %v646_v1  ;;  %vm653_vm11 = vweird.f32 %v646_v1 }
 0x22e   :  { %1560 = vrcp.f32 %v647_v6  ;;  %v674_v13 = vand.u32 2147483648, %v647_v6  ;;  %vm668_vm15 = vweird.f32 %v647_v6  ;;  %v672_v61 = vand.u32 2147483647, %v647_v6 }
 0x22f   :  { %v660_v47 = vor.u32 1.1754944e-38, %v659_v38  ;;  %vm658_vm13 = vcmp.eq.f32.partialorder %v657_v3, 8.507059e+37 }
 0x230   :  { %vm673_vm1 = vcmp.eq.f32.partialorder %v672_v61, 8.507059e+37 }
 0x233   :  { %v1559_v12 = vpop.eup %1558 }
 0x234   :  { %v1561_v49 = vpop.eup %1560  ;;  %v649_v62 = vmul.f32 %v1559_v12, %v646_v1  ;;  %vm654_vm10 = vweird.f32 %v1559_v12  ;;  %v675_v1 = vor.u32 1.1754944e-38, %v674_v13 }
 0x235   :  { %v664_v63 = vmul.f32 %v1561_v49, %v647_v6  ;;  %vm655_vm12 = vmor %vm653_vm11, %vm654_vm10  ;;  %vm669_vm14 = vweird.f32 %v1561_v49 }
 0x236   :  { %v650_v53 = vsub.f32 1.0, %v649_v62  ;;  %vm670_vm0 = vmor %vm668_vm15, %vm669_vm14 }
 0x237   :  { %v665_v5 = vsub.f32 1.0, %v664_v63 }
 0x238   :  { %v651_v21 = vmul.f32 %v1559_v12, %v650_v53  ;;  %v689_v53 = vpop.permute.xlu1 %688 }
 0x239   :  { %v666_v39 = vmul.f32 %v1561_v49, %v665_v5  ;;  %vm690_vm2 = vcmp.eq.s32.totalorder %v689_v53, 1 }
 0x23a   :  { %v652_v42 = vadd.f32 %v1559_v12, %v651_v21 }
 0x23b   :  { %v667_v43 = vadd.f32 %v1561_v49, %v666_v39 }
 0x23c   :  { %v656_v48 = vsel %vm655_vm12, %v1559_v12, %v652_v42 }
 0x23d   :  { %v661_v26 = vsel %vm658_vm13, %v660_v47, %v656_v48  ;;  %v671_v62 = vsel %vm670_vm0, %v1561_v49, %v667_v43  ;;  %v166_v49 = vadd.f32 %v2124_v59, %v2080_v22 }
 0x23e   :  { %v678_v50 = vmul.f32 %v661_v26, %v635_v45  ;;  %v676_v63 = vsel %vm673_vm1, %v675_v1, %v671_v62 }
 0x23f   :  { %v681_v28 = vsub.f32 1.0, %v676_v63  ;;  %v683_v38 = vmul.f32 %v676_v63, %v2158_v41 }
 0x240   :  { %v679_v17 = vadd.f32 %v678_v50, %v193_v52 }
 0x242   :  { %1562 = vtanh.f32 %v679_v17 }
 0x248   :  { %v1563_v12 = vpop.eup %1562 }
 0x249   :  { %v682_v5 = vmul.f32 %v1563_v12, %v681_v28  ;;  %v882_v28 = vsel %vm881_vm3, 1, %v2375_v51 }
 0x24a   :  { %884 = vperm.xlu2 %1532, %v882_v28  }
 0x24b   :  { %v684_v21 = vadd.f32 %v683_v38, %v682_v5 }
 0x24d   :  { %v2196_v20 = vsel %vm690_vm2, %v684_v21, %v2158_v41 }
 0x24e   :  { %v696_v6 = vpack.c.bf16 %v2196_v20, %v2196_v20 }
 0x250   :  { %705 = vmatmul.bf16.vlgmr.msrb.gmra.mxu3 %v696_v6  ;;  %718 = vmatmul.bf16.vlgmr.msrb.gmra.mxu0 %v696_v6 }
 0x251   :  { %731 = vmatmul.bf16.vlgmr.msrb.gmra.mxu1 %v696_v6  ;;  %919 = vmatpush.bf16.msrb.mxu3 %v1735_v18 }
 0x252   :  { %991 = vmatpush.bf16.msrb.mxu0 %v1705_v7  ;;  %1004 = vmatpush.bf16.msrb.mxu1 %v1850_v56 }
 0x255   :  { %920 = vmatpush.bf16.msrb.mxu3 %v1756_v24 }
 0x256   :  { %992 = vmatpush.bf16.msrb.mxu0 %v1714_v11  ;;  %1005 = vmatpush.bf16.msrb.mxu1 %v1886_v4 }
 0x259   :  { %921 = vmatpush.bf16.msrb.mxu3 %v1774_v30 }
 0x25a   :  { %993 = vmatpush.bf16.msrb.mxu0 %v1739_v19  ;;  %1006 = vmatpush.bf16.msrb.mxu1 %v1909_v15 }
 0x25d   :  { %922 = vmatpush.bf16.msrb.mxu3 %v1792_v36 }
 0x25e   :  { %994 = vmatpush.bf16.msrb.mxu0 %v1765_v27  ;;  %1007 = vmatpush.bf16.msrb.mxu1 %v1930_v23 }
 0x261   :  { %923 = vmatpush.bf16.msrb.mxu3 %v1844_v54 }
 0x262   :  { %995 = vmatpush.bf16.msrb.mxu0 %v1777_v31  ;;  %1008 = vmatpush.bf16.msrb.mxu1 %v1952_v29 }
 0x265   :  { %924 = vmatpush.bf16.msrb.mxu3 %v1873_v0 }
 0x266   :  { %996 = vmatpush.bf16.msrb.mxu0 %v1795_v37  ;;  %1009 = vmatpush.bf16.msrb.mxu1 %v1967_v34 }
 0x269   :  { %925 = vmatpush.bf16.msrb.mxu3 %v1898_v10 }
 0x26a   :  { %997 = vmatpush.bf16.msrb.mxu0 %v1816_v44  ;;  %1010 = vmatpush.bf16.msrb.mxu1 %v1980_v40 }
 0x26d   :  { %926 = vmatpush.bf16.msrb.mxu3 %v1912_v16 }
 0x26e   :  { %998 = vmatpush.bf16.msrb.mxu0 %v1847_v55  ;;  %1011 = vmatpush.bf16.msrb.mxu1 %v1998_v46 }
 0x2cd   :  { %v719_v41 = vpop.f32.mrf.mxu0 }
 0x2ce   :  { %v720_v3 = vadd.f32 %v719_v41, %v2084_v32  ;;  %v732_v39 = vpop.f32.mrf.mxu1  ;;  %v980_v41 = vsel %vm979_vm4, 1, %v2375_v51 }
 0x2cf   :  { %982 = vperm.xlu2 %1532, %v980_v41  }
 0x2d0   :  { %v737_v42 = vadd.f32 %v720_v3, %v166_v49 }
 0x2d2   :  { %v1445_v47 = vmul.f32 -1.442695, %v737_v42 }
 0x2d3   :  { %v706_v45 = vpop.f32.mrf.mxu3 }
 0x2d4   :  { %1564 = vpow2.f32 %v1445_v47  ;;  %v707_v48 = vadd.f32 %v706_v45, %v2071_v60  ;;  %v733_v47 = vadd.f32 %v732_v39, %v2088_v57 }
 0x2d5   :  { %v721_v26 = vpop.f32.mrf.mxu0 }
 0x2d6   :  { %v736_v43 = vadd.f32 %v707_v48, %v2066_v58  ;;  %v734_v52 = vpop.f32.mrf.mxu1  ;;  %v195_v26 = vadd.f32 %v2126_v25, %v2091_v8 }
 0x2d8   :  { %v1444_v50 = vmul.f32 -1.442695, %v736_v43 }
 0x2da   :  { %v1565_v13 = vpop.eup %1564  ;;  %1566 = vpow2.f32 %v1444_v50 }
 0x2db   :  { %v745_v61 = vadd.f32 1.0, %v1565_v13  ;;  %v708_v17 = vpop.f32.mrf.mxu3 }
 0x2dd   :  { %1568 = vrcp.f32 %v745_v61  ;;  %v772_v43 = vand.u32 2147483648, %v745_v61  ;;  %vm766_vm10 = vweird.f32 %v745_v61  ;;  %v770_v51 = vand.u32 2147483647, %v745_v61 }
 0x2df   :  { %v773_v17 = vor.u32 1.1754944e-38, %v772_v43  ;;  %vm771_vm12 = vcmp.eq.f32.partialorder %v770_v51, 8.507059e+37 }
 0x2e0   :  { %v1567_v59 = vpop.eup %1566 }
 0x2e1   :  { %v744_v62 = vadd.f32 1.0, %v1567_v59 }
 0x2e3   :  { %1570 = vrcp.f32 %v744_v62  ;;  %v1569_v1 = vpop.eup %1568  ;;  %v757_v38 = vand.u32 2147483648, %v744_v62  ;;  %v755_v6 = vand.u32 2147483647, %v744_v62  ;;  %vm751_vm6 = vweird.f32 %v744_v62 }
 0x2e4   :  { %v762_v63 = vmul.f32 %v1569_v1, %v745_v61  ;;  %vm767_vm9 = vweird.f32 %v1569_v1 }
 0x2e5   :  { %v758_v42 = vor.u32 1.1754944e-38, %v757_v38  ;;  %vm756_vm8 = vcmp.eq.f32.partialorder %v755_v6, 8.507059e+37  ;;  %vm768_vm11 = vmor %vm766_vm10, %vm767_vm9 }
 0x2e6   :  { %v763_v58 = vsub.f32 1.0, %v762_v63 }
 0x2e8   :  { %v764_v49 = vmul.f32 %v1569_v1, %v763_v58 }
 0x2e9   :  { %v1571_v12 = vpop.eup %1570 }
 0x2ea   :  { %v747_v53 = vmul.f32 %v1571_v12, %v744_v62  ;;  %vm752_vm5 = vweird.f32 %v1571_v12  ;;  %v765_v48 = vadd.f32 %v1569_v1, %v764_v49 }
 0x2eb   :  { %vm753_vm7 = vmor %vm751_vm6, %vm752_vm5 }
 0x2ec   :  { %v748_v5 = vsub.f32 1.0, %v747_v53  ;;  %v769_v13 = vsel %vm768_vm11, %v1569_v1, %v765_v48 }
 0x2ed   :  { %v774_v59 = vsel %vm771_vm12, %v773_v17, %v769_v13 }
 0x2ee   :  { %v749_v21 = vmul.f32 %v1571_v12, %v748_v5  ;;  %v779_v39 = vsub.f32 1.0, %v774_v59  ;;  %v781_v28 = vmul.f32 %v774_v59, %v2196_v20 }
 0x2f0   :  { %v750_v3 = vadd.f32 %v1571_v12, %v749_v21 }
 0x2f2   :  { %v754_v45 = vsel %vm753_vm7, %v1571_v12, %v750_v3  ;;  %v787_v12 = vpop.permute.xlu1 %786 }
 0x2f3   :  { %v759_v14 = vsel %vm756_vm8, %v758_v42, %v754_v45  ;;  %vm788_vm13 = vcmp.eq.s32.totalorder %v787_v12, 1 }
 0x2f4   :  { %v776_v52 = vmul.f32 %v759_v14, %v733_v47 }
 0x2f6   :  { %v777_v50 = vadd.f32 %v776_v52, %v195_v26  ;;  %v198_v26 = vadd.f32 %v2130_v35, %v2091_v8 }
 0x2f8   :  { %1572 = vtanh.f32 %v777_v50 }
 0x2fe   :  { %v1573_v62 = vpop.eup %1572 }
 0x2ff   :  { %v780_v63 = vmul.f32 %v1573_v62, %v779_v39 }
 0x301   :  { %v782_v53 = vadd.f32 %v781_v28, %v780_v63  ;;  %v885_v63 = vpop.permute.xlu2 %884 }
 0x302   :  { %vm886_vm6 = vcmp.eq.s32.totalorder %v885_v63, 1  ;;  %v2378_v63 = vld [vmem:[#allocation10_spill] sm:$0xff] }
 0x303   :  { %v2238_v25 = vsel %vm788_vm13, %v782_v53, %v2196_v20 }
 0x304   :  { %v794_v61 = vpack.c.bf16 %v2238_v25, %v2238_v25 }
 0x306   :  { %803 = vmatmul.bf16.vlgmr.msrb.gmra.mxu2 %v794_v61  ;;  %816 = vmatmul.bf16.vlgmr.msra.gmra.mxu3 %v794_v61 }
 0x307   :  { %829 = vmatmul.bf16.vlgmr.msra.gmra.mxu0 %v794_v61  ;;  %1017 = vmatpush.bf16.msrb.mxu2 %v1735_v18 }
 0x308   :  { %1089 = vmatpush.bf16.msra.mxu3 %v1705_v7  ;;  %1102 = vmatpush.bf16.msra.mxu0 %v1850_v56 }
 0x30b   :  { %1018 = vmatpush.bf16.msrb.mxu2 %v1756_v24 }
 0x30c   :  { %1090 = vmatpush.bf16.msra.mxu3 %v1714_v11  ;;  %1103 = vmatpush.bf16.msra.mxu0 %v1886_v4 }
 0x30f   :  { %1019 = vmatpush.bf16.msrb.mxu2 %v1774_v30 }
 0x310   :  { %1091 = vmatpush.bf16.msra.mxu3 %v1739_v19  ;;  %1104 = vmatpush.bf16.msra.mxu0 %v1909_v15 }
 0x313   :  { %1020 = vmatpush.bf16.msrb.mxu2 %v1792_v36 }
 0x314   :  { %1092 = vmatpush.bf16.msra.mxu3 %v1765_v27  ;;  %1105 = vmatpush.bf16.msra.mxu0 %v1930_v23  ;;  %v169_v27 = vadd.f32 %v2128_v33, %v2080_v22 }
 0x317   :  { %1021 = vmatpush.bf16.msrb.mxu2 %v1844_v54 }
 0x318   :  { %1093 = vmatpush.bf16.msra.mxu3 %v1777_v31  ;;  %1106 = vmatpush.bf16.msra.mxu0 %v1952_v29 }
 0x31b   :  { %1022 = vmatpush.bf16.msrb.mxu2 %v1873_v0 }
 0x31c   :  { %1094 = vmatpush.bf16.msra.mxu3 %v1795_v37  ;;  %1107 = vmatpush.bf16.msra.mxu0 %v1967_v34 }
 0x31f   :  { %1023 = vmatpush.bf16.msrb.mxu2 %v1898_v10 }
 0x320   :  { %1095 = vmatpush.bf16.msra.mxu3 %v1816_v44  ;;  %1108 = vmatpush.bf16.msra.mxu0 %v1980_v40 }
 0x323   :  { %1024 = vmatpush.bf16.msrb.mxu2 %v1912_v16 }
 0x324   :  { %1096 = vmatpush.bf16.msra.mxu3 %v1847_v55  ;;  %1109 = vmatpush.bf16.msra.mxu0 %v1998_v46 }
 0x384   :  { %v830_v7 = vpop.f32.mrf.mxu0 }
 0x385   :  { %v831_v47 = vadd.f32 %v830_v7, %v2088_v57 }
 0x389   :  { %v804_v11 = vpop.f32.mrf.mxu2  ;;  %v817_v19 = vpop.f32.mrf.mxu3 }
 0x38a   :  { %v805_v31 = vadd.f32 %v804_v11, %v2071_v60  ;;  %v818_v37 = vadd.f32 %v817_v19, %v2084_v32 }
 0x38c   :  { %v834_v44 = vadd.f32 %v805_v31, %v2074_v2  ;;  %v835_v56 = vadd.f32 %v818_v37, %v169_v27  ;;  %v832_v4 = vpop.f32.mrf.mxu0 }
 0x38e   :  { %v1446_v15 = vmul.f32 -1.442695, %v834_v44  ;;  %v1447_v23 = vmul.f32 -1.442695, %v835_v56 }
 0x390   :  { %1574 = vpow2.f32 %v1446_v15 }
 0x391   :  { %1576 = vpow2.f32 %v1447_v23  ;;  %v806_v55 = vpop.f32.mrf.mxu2  ;;  %v819_v29 = vpop.f32.mrf.mxu3 }
 0x396   :  { %v1575_v34 = vpop.eup %1574 }
 0x397   :  { %v1577_v40 = vpop.eup %1576  ;;  %v842_v46 = vadd.f32 1.0, %v1575_v34 }
 0x398   :  { %v843_v20 = vadd.f32 1.0, %v1577_v40 }
 0x399   :  { %1578 = vrcp.f32 %v842_v46  ;;  %v855_v2 = vand.u32 2147483648, %v842_v46  ;;  %v853_v41 = vand.u32 2147483647, %v842_v46  ;;  %vm849_vm15 = vweird.f32 %v842_v46 }
 0x39a   :  { %1580 = vrcp.f32 %v843_v20  ;;  %v870_v43 = vand.u32 2147483648, %v843_v20  ;;  %vm864_vm3 = vweird.f32 %v843_v20  ;;  %v868_v51 = vand.u32 2147483647, %v843_v20 }
 0x39b   :  { %v856_v42 = vor.u32 1.1754944e-38, %v855_v2  ;;  %vm854_vm1 = vcmp.eq.f32.partialorder %v853_v41, 8.507059e+37 }
 0x39c   :  { %v871_v17 = vor.u32 1.1754944e-38, %v870_v43  ;;  %vm869_vm5 = vcmp.eq.f32.partialorder %v868_v51, 8.507059e+37 }
 0x39f   :  { %v1579_v33 = vpop.eup %1578 }
 0x3a0   :  { %v1581_v1 = vpop.eup %1580  ;;  %v845_v58 = vmul.f32 %v1579_v33, %v842_v46  ;;  %vm850_vm14 = vweird.f32 %v1579_v33 }
 0x3a1   :  { %v860_v5 = vmul.f32 %v1581_v1, %v843_v20  ;;  %vm851_vm0 = vmor %vm849_vm15, %vm850_vm14  ;;  %vm865_vm2 = vweird.f32 %v1581_v1 }
 0x3a2   :  { %v846_v38 = vsub.f32 1.0, %v845_v58  ;;  %vm866_vm4 = vmor %vm864_vm3, %vm865_vm2 }
 0x3a3   :  { %v861_v21 = vsub.f32 1.0, %v860_v5 }
 0x3a4   :  { %v847_v6 = vmul.f32 %v1579_v33, %v846_v38  ;;  %v2377_v38 = vld [vmem:[#allocation9_spill] sm:$0xff] }
 0x3a5   :  { %v862_v49 = vmul.f32 %v1581_v1, %v861_v21  ;;  %v200_v2 = vadd.f32 %v2377_v38, %v2091_v8 }
 0x3a6   :  { %v848_v3 = vadd.f32 %v1579_v33, %v847_v6 }
 0x3a7   :  { %v863_v14 = vadd.f32 %v1581_v1, %v862_v49 }
 0x3a8   :  { %v852_v45 = vsel %vm851_vm0, %v1579_v33, %v848_v3 }
 0x3a9   :  { %v857_v48 = vsel %vm854_vm1, %v856_v42, %v852_v45  ;;  %v867_v13 = vsel %vm866_vm4, %v1581_v1, %v863_v14 }
 0x3aa   :  { %v874_v52 = vmul.f32 %v857_v48, %v831_v47  ;;  %v872_v59 = vsel %vm869_vm5, %v871_v17, %v867_v13 }
 0x3ab   :  { %v877_v39 = vsub.f32 1.0, %v872_v59  ;;  %v879_v12 = vmul.f32 %v872_v59, %v2238_v25 }
 0x3ac   :  { %v875_v50 = vadd.f32 %v874_v52, %v198_v26  ;;  %v983_v52 = vpop.permute.xlu2 %982 }
 0x3ad   :  { %vm984_vm15 = vcmp.eq.s32.totalorder %v983_v52, 1  ;;  %v1526_v52 = vld [vmem:[%s2362_s6 + $0x30] sm:$0xff] }
 0x3ae   :  { %1582 = vtanh.f32 %v875_v50 }
 0x3b4   :  { %v1583_v62 = vpop.eup %1582 }
 0x3b5   :  { %v878_v28 = vmul.f32 %v1583_v62, %v877_v39 }
 0x3b7   :  { %v880_v53 = vadd.f32 %v879_v12, %v878_v28  ;;  %v174_v28 = vadd.f32 %v2378_v63, %v2080_v22 }
 0x3b9   :  { %v2276_v35 = vsel %vm886_vm6, %v880_v53, %v2238_v25 }
 0x3ba   :  { %v892_v61 = vpack.c.bf16 %v2276_v35, %v2276_v35 }
 0x3bc   :  { %901 = vmatmul.bf16.vlgmr.msra.gmra.mxu1 %v892_v61  ;;  %914 = vmatmul.bf16.vlgmr.msra.gmra.mxu2 %v892_v61 }
 0x3bd   :  { %927 = vmatmul.bf16.vlgmr.msrb.gmra.mxu3 %v892_v61  ;;  %1115 = vmatpush.bf16.msra.mxu1 %v1735_v18  ;;  %v2379_v61 = vld [vmem:[#allocation6_spill] sm:$0xff] }
 0x3c1   :  { %1116 = vmatpush.bf16.msra.mxu1 %v1756_v24  ;;  %v2376_v24 = vld [vmem:[#allocation8_spill] sm:$0xff] }
 0x3c5   :  { %1117 = vmatpush.bf16.msra.mxu1 %v1774_v30  ;;  %v171_v30 = vadd.f32 %v2376_v24, %v2080_v22 }
 0x3c9   :  { %1118 = vmatpush.bf16.msra.mxu1 %v1792_v36 }
 0x3cd   :  { %1119 = vmatpush.bf16.msra.mxu1 %v1844_v54 }
 0x3d1   :  { %1120 = vmatpush.bf16.msra.mxu1 %v1873_v0 }
 0x3d5   :  { %1121 = vmatpush.bf16.msra.mxu1 %v1898_v10 }
 0x3d9   :  { %1122 = vmatpush.bf16.msra.mxu1 %v1912_v16 }
 0x439   :  { %v902_v25 = vpop.f32.mrf.mxu1 }
 0x43a   :  { %v903_v7 = vadd.f32 %v902_v25, %v2071_v60 }
 0x43c   :  { %v932_v11 = vadd.f32 %v903_v7, %v2076_v9 }
 0x43e   :  { %v1448_v18 = vmul.f32 -1.442695, %v932_v11 }
 0x43f   :  { %v915_v19 = vpop.f32.mrf.mxu2 }
 0x440   :  { %1584 = vpow2.f32 %v1448_v18  ;;  %v916_v36 = vadd.f32 %v915_v19, %v2084_v32  ;;  %v928_v54 = vpop.f32.mrf.mxu3 }
 0x441   :  { %v904_v27 = vpop.f32.mrf.mxu1  ;;  %v929_v58 = vadd.f32 %v928_v54, %v2088_v57 }
 0x442   :  { %v933_v0 = vadd.f32 %v916_v36, %v171_v30 }
 0x444   :  { %v1449_v31 = vmul.f32 -1.442695, %v933_v0 }
 0x446   :  { %v1585_v10 = vpop.eup %1584  ;;  %1586 = vpow2.f32 %v1449_v31 }
 0x447   :  { %v940_v16 = vadd.f32 1.0, %v1585_v10  ;;  %v917_v37 = vpop.f32.mrf.mxu2 }
 0x448   :  { %v930_v44 = vpop.f32.mrf.mxu3 }
 0x449   :  { %1588 = vrcp.f32 %v940_v16  ;;  %v953_v55 = vand.u32 2147483648, %v940_v16  ;;  %v951_v34 = vand.u32 2147483647, %v940_v16  ;;  %vm947_vm8 = vweird.f32 %v940_v16 }
 0x44b   :  { %v954_v33 = vor.u32 1.1754944e-38, %v953_v55  ;;  %vm952_vm10 = vcmp.eq.f32.partialorder %v951_v34, 8.507059e+37 }
 0x44c   :  { %v1587_v56 = vpop.eup %1586 }
 0x44d   :  { %v941_v9 = vadd.f32 1.0, %v1587_v56 }
 0x44f   :  { %v1589_v4 = vpop.eup %1588  ;;  %1590 = vrcp.f32 %v941_v9  ;;  %v968_v41 = vand.u32 2147483648, %v941_v9  ;;  %v966_v3 = vand.u32 2147483647, %v941_v9  ;;  %vm962_vm12 = vweird.f32 %v941_v9 }
 0x450   :  { %v943_v15 = vmul.f32 %v1589_v4, %v940_v16  ;;  %vm948_vm7 = vweird.f32 %v1589_v4 }
 0x451   :  { %vm949_vm9 = vmor %vm947_vm8, %vm948_vm7  ;;  %v969_v45 = vor.u32 1.1754944e-38, %v968_v41  ;;  %vm967_vm14 = vcmp.eq.f32.partialorder %v966_v3, 8.507059e+37 }
 0x452   :  { %v944_v23 = vsub.f32 1.0, %v943_v15 }
 0x454   :  { %v945_v29 = vmul.f32 %v1589_v4, %v944_v23 }
 0x455   :  { %v1591_v40 = vpop.eup %1590 }
 0x456   :  { %v958_v46 = vmul.f32 %v1591_v40, %v941_v9  ;;  %v946_v20 = vadd.f32 %v1589_v4, %v945_v29  ;;  %vm963_vm11 = vweird.f32 %v1591_v40 }
 0x457   :  { %vm964_vm13 = vmor %vm962_vm12, %vm963_vm11 }
 0x458   :  { %v959_v1 = vsub.f32 1.0, %v958_v46  ;;  %v950_v5 = vsel %vm949_vm9, %v1589_v4, %v946_v20 }
 0x459   :  { %v955_v21 = vsel %vm952_vm10, %v954_v33, %v950_v5  ;;  %v2380_v33 = vld [vmem:[#allocation11_spill] sm:$0xff] }
 0x45a   :  { %v960_v6 = vmul.f32 %v1591_v40, %v959_v1  ;;  %v972_v49 = vmul.f32 %v955_v21, %v929_v58  ;;  %v203_v1 = vadd.f32 %v2380_v33, %v2091_v8 }
 0x45c   :  { %v961_v42 = vadd.f32 %v1591_v40, %v960_v6  ;;  %v973_v47 = vadd.f32 %v972_v49, %v200_v2 }
 0x45e   :  { %v965_v48 = vsel %vm964_vm13, %v1591_v40, %v961_v42  ;;  %1592 = vtanh.f32 %v973_v47  ;;  %v1081_v42 = vpop.permute.xlu0 %1080 }
 0x45f   :  { %v970_v14 = vsel %vm967_vm14, %v969_v45, %v965_v48  ;;  %vm1082_vm8 = vcmp.eq.s32.totalorder %v1081_v42, 1 }
 0x460   :  { %v975_v26 = vsub.f32 1.0, %v970_v14  ;;  %v977_v50 = vmul.f32 %v970_v14, %v2276_v35 }
 0x464   :  { %v1593_v43 = vpop.eup %1592 }
 0x465   :  { %v976_v51 = vmul.f32 %v1593_v43, %v975_v26  ;;  %v1527_v43 = vld [vmem:[%s2362_s6 + $0x38] sm:$0xff] }
 0x466   :  { %1251 = vmatpush.bf16.msra.mxu2 %v1527_v43 }
 0x467   :  { %v978_v13 = vadd.f32 %v977_v50, %v976_v51  ;;  %v2381_v50 = vld [vmem:[#allocation12_spill] sm:$0xff] }
 0x469   :  { %v2298_v17 = vsel %vm984_vm15, %v978_v13, %v2276_v35  ;;  %v176_v13 = vadd.f32 %v2381_v50, %v2080_v22  ;;  %v1523_v22 = vld [vmem:[%s2362_s6 + $0x18] sm:$0xff] }
 0x46a   :  { %v990_v59 = vpack.c.bf16 %v2298_v17, %v2298_v17  ;;  %1252 = vmatpush.bf16.msra.mxu2 %v1526_v52 }
 0x46c   :  { %999 = vmatmul.bf16.vlgmr.msrb.gmra.mxu0 %v990_v59  ;;  %1012 = vmatmul.bf16.vlgmr.msrb.gmra.mxu1 %v990_v59 }
 0x46d   :  { %1025 = vmatmul.bf16.vlgmr.msrb.gmra.mxu2 %v990_v59 }
 0x4e9   :  { %v1000_v39 = vpop.f32.mrf.mxu0  ;;  %v1013_v62 = vpop.f32.mrf.mxu1 }
 0x4ea   :  { %v1001_v12 = vadd.f32 %v1000_v39, %v2071_v60  ;;  %v1014_v53 = vadd.f32 %v1013_v62, %v2084_v32  ;;  %v1525_v39 = vld [vmem:[%s2362_s6 + $0x28] sm:$0xff] }
 0x4eb   :  { %1253 = vmatpush.bf16.msra.mxu2 %v1525_v39 }
 0x4ec   :  { %v1030_v25 = vadd.f32 %v1001_v12, %v2379_v61  ;;  %v1031_v7 = vadd.f32 %v1014_v53, %v174_v28  ;;  %v1524_v28 = vld [vmem:[%s2362_s6 + $0x20] sm:$0xff]  ;;  %v2382_v61 = vld [vmem:[#allocation7_spill] sm:$0xff] }
 0x4ee   :  { %v1450_v35 = vmul.f32 -1.442695, %v1030_v25  ;;  %v1451_v11 = vmul.f32 -1.442695, %v1031_v7 }
 0x4ef   :  { %1254 = vmatpush.bf16.msra.mxu2 %v1524_v28 }
 0x4f0   :  { %1594 = vpow2.f32 %v1450_v35  ;;  %v1026_v18 = vpop.f32.mrf.mxu2 }
 0x4f1   :  { %1596 = vpow2.f32 %v1451_v11  ;;  %v1002_v19 = vpop.f32.mrf.mxu0  ;;  %v1015_v24 = vpop.f32.mrf.mxu1  ;;  %v1027_v34 = vadd.f32 %v1026_v18, %v2088_v57  ;;  %v1522_v11 = vld [vmem:[%s2362_s6 + $0x10] sm:$0xff] }
 0x4f3   :  { %1255 = vmatpush.bf16.msra.mxu2 %v1523_v22 }
 0x4f6   :  { %v1595_v30 = vpop.eup %1594 }
 0x4f7   :  { %v1597_v36 = vpop.eup %1596  ;;  %v1038_v54 = vadd.f32 1.0, %v1595_v30  ;;  %1256 = vmatpush.bf16.msra.mxu2 %v1522_v11 }
 0x4f8   :  { %v1039_v27 = vadd.f32 1.0, %v1597_v36  ;;  %v1028_v0 = vpop.f32.mrf.mxu2  ;;  %v1520_v36 = vld [vmem:[%s2362_s6] sm:$0xff] }
 0x4f9   :  { %1598 = vrcp.f32 %v1038_v54  ;;  %v1051_v9 = vand.u32 2147483648, %v1038_v54  ;;  %v1049_v15 = vand.u32 2147483647, %v1038_v54  ;;  %vm1045_vm1 = vweird.f32 %v1038_v54 }
 0x4fa   :  { %1600 = vrcp.f32 %v1039_v27  ;;  %v1066_v58 = vand.u32 2147483648, %v1039_v27  ;;  %vm1060_vm5 = vweird.f32 %v1039_v27  ;;  %v1064_v38 = vand.u32 2147483647, %v1039_v27 }
 0x4fb   :  { %v1052_v29 = vor.u32 1.1754944e-38, %v1051_v9  ;;  %vm1050_vm3 = vcmp.eq.f32.partialorder %v1049_v15, 8.507059e+37 }
 0x4fc   :  { %v1067_v6 = vor.u32 1.1754944e-38, %v1066_v58  ;;  %vm1065_vm7 = vcmp.eq.f32.partialorder %v1064_v38, 8.507059e+37 }
 0x4ff   :  { %v1599_v31 = vpop.eup %1598 }
 0x500   :  { %v1601_v10 = vpop.eup %1600  ;;  %v1041_v16 = vmul.f32 %v1599_v31, %v1038_v54  ;;  %vm1046_vm0 = vweird.f32 %v1599_v31 }
 0x501   :  { %v1056_v37 = vmul.f32 %v1601_v10, %v1039_v27  ;;  %vm1047_vm2 = vmor %vm1045_vm1, %vm1046_vm0  ;;  %vm1061_vm4 = vweird.f32 %v1601_v10 }
 0x502   :  { %v1042_v44 = vsub.f32 1.0, %v1041_v16  ;;  %vm1062_vm6 = vmor %vm1060_vm5, %vm1061_vm4 }
 0x503   :  { %v1057_v56 = vsub.f32 1.0, %v1056_v37 }
 0x504   :  { %v1043_v4 = vmul.f32 %v1599_v31, %v1042_v44 }
 0x505   :  { %v1058_v23 = vmul.f32 %v1601_v10, %v1057_v56 }
 0x506   :  { %v1044_v55 = vadd.f32 %v1599_v31, %v1043_v4 }
 0x507   :  { %v1059_v20 = vadd.f32 %v1601_v10, %v1058_v23 }
 0x508   :  { %v1048_v40 = vsel %vm1047_vm2, %v1599_v31, %v1044_v55 }
 0x509   :  { %v1053_v46 = vsel %vm1050_vm3, %v1052_v29, %v1048_v40  ;;  %v1063_v21 = vsel %vm1062_vm6, %v1601_v10, %v1059_v20 }
 0x50a   :  { %v1070_v5 = vmul.f32 %v1053_v46, %v1027_v34  ;;  %v1068_v41 = vsel %vm1065_vm7, %v1067_v6, %v1063_v21  ;;  %v2383_v46 = vld [vmem:[#allocation13_spill] sm:$0xff] }
 0x50b   :  { %v1073_v49 = vsub.f32 1.0, %v1068_v41  ;;  %v1075_v45 = vmul.f32 %v1068_v41, %v2298_v17  ;;  %v205_v20 = vadd.f32 %v2383_v46, %v2091_v8  ;;  %v1179_v41 = vpop.permute.xlu1 %1178 }
 0x50c   :  { %v1071_v2 = vadd.f32 %v1070_v5, %v203_v1  ;;  %vm1180_vm1 = vcmp.eq.s32.totalorder %v1179_v41, 1 }
 0x50e   :  { %1602 = vtanh.f32 %v1071_v2 }
 0x514   :  { %v1603_v3 = vpop.eup %1602 }
 0x515   :  { %v1074_v47 = vmul.f32 %v1603_v3, %v1073_v49 }
 0x517   :  { %v1076_v48 = vadd.f32 %v1075_v45, %v1074_v47  ;;  %v1533_v45 = vld [vmem:[%s2363_s7] ss:$0 sm:$0xff] }
 0x519   :  { %v2312_v14 = vsel %vm1082_vm8, %v1076_v48, %v2298_v17 }
 0x51a   :  { %v1088_v26 = vpack.c.bf16 %v2312_v14, %v2312_v14 }
 0x51c   :  { %1097 = vmatmul.bf16.vlgmr.msra.gmra.mxu3 %v1088_v26  ;;  %1110 = vmatmul.bf16.vlgmr.msra.gmra.mxu0 %v1088_v26 }
 0x51d   :  { %1123 = vmatmul.bf16.vlgmr.msra.gmra.mxu1 %v1088_v26 }
 0x599   :  { %v1111_v51 = vpop.f32.mrf.mxu0 }
 0x59a   :  { %v1112_v17 = vadd.f32 %v1111_v51, %v2084_v32  ;;  %v1124_v59 = vpop.f32.mrf.mxu1 }
 0x59b   :  { %v1125_v55 = vadd.f32 %v1124_v59, %v2088_v57 }
 0x59c   :  { %v1129_v62 = vadd.f32 %v1112_v17, %v176_v13 }
 0x59e   :  { %v1453_v63 = vmul.f32 -1.442695, %v1129_v62 }
 0x59f   :  { %v1098_v12 = vpop.f32.mrf.mxu3 }
 0x5a0   :  { %1604 = vpow2.f32 %v1453_v63  ;;  %v1099_v53 = vadd.f32 %v1098_v12, %v2071_v60  ;;  %v1521_v60 = vld [vmem:[%s2362_s6 + $0x8] sm:$0xff] }
 0x5a1   :  { %v1113_v32 = vpop.f32.mrf.mxu0  ;;  %1257 = vmatpush.bf16.msra.mxu2 %v1521_v60 }
 0x5a2   :  { %v1128_v25 = vadd.f32 %v1099_v53, %v2382_v61  ;;  %v1126_v7 = vpop.f32.mrf.mxu1 }
 0x5a4   :  { %v1452_v35 = vmul.f32 -1.442695, %v1128_v25 }
 0x5a5   :  { %1258 = vmatpush.bf16.msra.mxu2 %v1520_v36 }
 0x5a6   :  { %v1605_v18 = vpop.eup %1604  ;;  %1606 = vpow2.f32 %v1452_v35 }
 0x5a7   :  { %v1137_v19 = vadd.f32 1.0, %v1605_v18  ;;  %v1100_v24 = vpop.f32.mrf.mxu3 }
 0x5a9   :  { %1608 = vrcp.f32 %v1137_v19  ;;  %v1164_v33 = vand.u32 2147483648, %v1137_v19  ;;  %vm1158_vm14 = vweird.f32 %v1137_v19  ;;  %v1162_v58 = vand.u32 2147483647, %v1137_v19 }
 0x5ab   :  { %v1165_v2 = vor.u32 1.1754944e-38, %v1164_v33  ;;  %vm1163_vm0 = vcmp.eq.f32.partialorder %v1162_v58, 8.507059e+37 }
 0x5ac   :  { %v1607_v30 = vpop.eup %1606 }
 0x5ad   :  { %v1136_v54 = vadd.f32 1.0, %v1607_v30 }
 0x5af   :  { %1610 = vrcp.f32 %v1136_v54  ;;  %v1609_v27 = vpop.eup %1608  ;;  %v1149_v44 = vand.u32 2147483648, %v1136_v54  ;;  %v1147_v9 = vand.u32 2147483647, %v1136_v54  ;;  %vm1143_vm10 = vweird.f32 %v1136_v54 }
 0x5b0   :  { %v1154_v0 = vmul.f32 %v1609_v27, %v1137_v19  ;;  %vm1159_vm13 = vweird.f32 %v1609_v27 }
 0x5b1   :  { %v1150_v23 = vor.u32 1.1754944e-38, %v1149_v44  ;;  %vm1148_vm12 = vcmp.eq.f32.partialorder %v1147_v9, 8.507059e+37  ;;  %vm1160_vm15 = vmor %vm1158_vm14, %vm1159_vm13 }
 0x5b2   :  { %v1155_v16 = vsub.f32 1.0, %v1154_v0 }
 0x5b4   :  { %v1156_v4 = vmul.f32 %v1609_v27, %v1155_v16 }
 0x5b5   :  { %v1611_v31 = vpop.eup %1610 }
 0x5b6   :  { %v1139_v10 = vmul.f32 %v1611_v31, %v1136_v54  ;;  %vm1144_vm9 = vweird.f32 %v1611_v31  ;;  %v1157_v40 = vadd.f32 %v1609_v27, %v1156_v4 }
 0x5b7   :  { %vm1145_vm11 = vmor %vm1143_vm10, %vm1144_vm9 }
 0x5b8   :  { %v1140_v37 = vsub.f32 1.0, %v1139_v10  ;;  %v1161_v38 = vsel %vm1160_vm15, %v1609_v27, %v1157_v40 }
 0x5b9   :  { %v1166_v21 = vsel %vm1163_vm0, %v1165_v2, %v1161_v38 }
 0x5ba   :  { %v1141_v56 = vmul.f32 %v1611_v31, %v1140_v37  ;;  %v1171_v57 = vsub.f32 1.0, %v1166_v21  ;;  %v1173_v3 = vmul.f32 %v1166_v21, %v2312_v14 }
 0x5bc   :  { %v1142_v15 = vadd.f32 %v1611_v31, %v1141_v56 }
 0x5be   :  { %v1146_v29 = vsel %vm1145_vm11, %v1611_v31, %v1142_v15 }
 0x5bf   :  { %v1151_v34 = vsel %vm1148_vm12, %v1150_v23, %v1146_v29 }
 0x5c0   :  { %v1168_v1 = vmul.f32 %v1151_v34, %v1125_v55 }
 0x5c2   :  { %v1169_v5 = vadd.f32 %v1168_v1, %v205_v20 }
 0x5c4   :  { %1612 = vtanh.f32 %v1169_v5 }
 0x5ca   :  { %v1613_v6 = vpop.eup %1612 }
 0x5cb   :  { %v1172_v49 = vmul.f32 %v1613_v6, %v1171_v57 }
 0x5cd   :  { %v1174_v42 = vadd.f32 %v1173_v3, %v1172_v49 }
 0x5cf   :  { %v1181_v8 = vsel %vm1180_vm1, %v1174_v42, %v2312_v14 }
 0x5d0   :  { %v1182_v47 = vpack.c.bf16 %v1181_v8, %v1181_v8 }
 0x5d2   :  { %1259 = vmatmul.bf16.vlgmr.msra.gmra.mxu2 %v1182_v47 }
 0x655   :  { %v1260_v48 = vpop.f32.mrf.mxu2 }
 0x656   :  { %v1261_v26 = vadd.f32 %v1533_v45, %v1260_v48 }
 0x658   :  { %1264 = vst [vmem:[#allocation3] sm:$0xff] %v1261_v26 }
 0x659   :  { %1275 = dma.vmem_to_hbm [thread:$0]  %s1271_s16, 128, %s1273_s19, [#allocation4]  }
 0x65d   :  { %v1262_v43 = vpop.f32.mrf.mxu2 }
 0x65e   :  { %1638 = dma.done.wait [#allocation4], 128  }
 0x65f   :  { %1639 = vsyncadd [#allocation4], 4294967168 }
 0x660   :  { %1280 = vsyncpa [#allocation4], 1 }

</bundles_post_ra>
